<compile_context>
chip_gen: v7x
topology: tpu7x:2x2x1
jax: 0.10.0
libtpu: 0.0.40
codegen_flags: <defaults>
</compile_context>

<pallas_src>
import jax
import jax.numpy as jnp
import numpy as np
from jax import lax
from jax.experimental import pallas as pl
from jax.experimental.pallas import tpu as pltpu

# ----------------------------- problem sizes ---------------------------------
B = 2        # batch
T = 8        # time steps / GAT channels
N = 16       # graph nodes (also LSTM input size)
M = 32       # LSTM hidden size
F_FEAT = 4   # raw feature dim (contracted to 1 by Linear A)
BN = B * N
TF = T * F_FEAT

# ---------------------- packed weight-slab row offsets ------------------------
# (every segment starts at an 8-aligned row, column 0; slab is (256, 128) f32)
_R_WCOMB = 0      # (T, T*F)   gat_w (x) a_w
_R_UEW   = 8      # (T, T)     U_e
_R_ADST  = 16     # (T, 1)     att_dst as a column
_R_WB    = 24     # (T, 1)     a_b * rowsum(gat_w)  (folded Linear-A bias)
_R_GATB  = 32     # (T, 1)     GAT output bias
_R_MASK  = 40     # (BN, BN)   block-diag additive adjacency mask (0 / -1e30)
_R_WEWT  = 72     # (2M, T)    W_e^T
_R_WCAT  = 136    # (N+M, 4M)  [wih | whh]^T
_R_PSEL  = 184    # (BN, N)    lane->(batch,node) projection (stacked identities)
_R_EXP   = 216    # (B, BN)    per-batch block indicator
_R_WEB   = 224    # (1, T)     W_e bias
_R_ASRC  = 232    # (1, T)     att_src as a row
_R_VE    = 240    # (1, T)     v_e
_R_LSTMB = 248    # (1, 4M)    bih + bhh
_SLAB_ROWS = 256


# ------------------------------ fused kernel ----------------------------------
def fused_kernel(x_ref, w_ref, out_ref):
    # ---- hoisted constant loads (read once, reused across the whole kernel) ----
    w_comb   = w_ref[_R_WCOMB:_R_WCOMB + T, 0:TF]          # (8, 32)
    ue_w     = w_ref[_R_UEW:_R_UEW + T, 0:T]                # (8, 8)
    adst_col = w_ref[_R_ADST:_R_ADST + T, 0:1]              # (8, 1)
    wb_col   = w_ref[_R_WB:_R_WB + T, 0:1]                  # (8, 1)
    gatb_col = w_ref[_R_GATB:_R_GATB + T, 0:1]              # (8, 1)
    mask_add = w_ref[_R_MASK:_R_MASK + BN, 0:BN]            # (32, 32)
    we_wT    = w_ref[_R_WEWT:_R_WEWT + 2 * M, 0:T]          # (64, 8)
    w_catT   = w_ref[_R_WCAT:_R_WCAT + N + M, 0:4 * M]      # (48, 128)
    p_sel    = w_ref[_R_PSEL:_R_PSEL + BN, 0:N]             # (32, 16)
    expand_e = w_ref[_R_EXP:_R_EXP + B, 0:BN]                # (2, 32)
    we_b     = w_ref[_R_WEB:_R_WEB + 1, 0:T]                # (1, 8)
    asrc_row = w_ref[_R_ASRC:_R_ASRC + 1, 0:T]              # (1, 8)
    ve_row   = w_ref[_R_VE:_R_VE + 1, 0:T]                  # (1, 8)
    lstm_b   = w_ref[_R_LSTMB:_R_LSTMB + 1, 0:4 * M]        # (1, 128)

    x = x_ref[...]                                           # (T*F, B*N) = (32, 32)

    # ---- GAT (Linear-A folded into W_comb), both batches stacked in lanes ----
    # wxT[t, b*N+n] = wx[b, n, t]
    wxT = jnp.dot(w_comb, x, preferred_element_type=jnp.float32) + wb_col    # (T, BN)
    a_src = jnp.dot(asrc_row, wxT, preferred_element_type=jnp.float32)       # (1, BN)
    a_dst = lax.dot_general(wxT, adst_col, (((0,), (0,)), ((), ())),
                            preferred_element_type=jnp.float32)              # (BN, 1)
    s = a_dst + a_src                        # s[i, j] = a_dst[i] + a_src[j]
    s = jnp.where(s > 0, s, 0.2 * s)         # leaky_relu(0.2)
    s = s + mask_add                         # block-diag adjacency, -1e30 elsewhere
    s = s - jnp.max(s, axis=-1, keepdims=True)
    p = jnp.exp(s)
    p = p * pl.reciprocal(jnp.sum(p, axis=-1, keepdims=True), approx=True)   # (BN, BN)

    # g[t, b*N+i] = new_input[b, t, i]
    g = lax.dot_general(wxT, p, (((1,), (1,)), ((), ())),
                        preferred_element_type=jnp.float32) + gatb_col        # (T, BN)

    # ---- temporal attention + LSTMCell recurrence (batch in sublanes) ----
    y = jnp.dot(ue_w, g, preferred_element_type=jnp.float32)                  # (T, BN)

    hc = jnp.zeros((B, 2 * M), jnp.float32)                  # [h | c] per batch row
    for t in range(T):                                       # static unroll
        # x_t = W_e([h; c]) : one MXU push, then expand to stacked columns
        xt = jnp.dot(hc, we_wT, preferred_element_type=jnp.float32) + we_b    # (B, T)
        xt_cols = lax.dot_general(xt, expand_e, (((0,), (0,)), ((), ())),
                                  preferred_element_type=jnp.float32)         # (T, BN)
        z = jnp.tanh(xt_cols + y)                                             # (T, BN)
        e = jnp.dot(ve_row, z, preferred_element_type=jnp.float32)            # (1, BN)
        pe = jnp.exp(e)                      # no max-sub: |e| <= sum|ve| (tiny)

        # unnormalized alpha * g_t, relayout lanes -> (B, N) rows via P_sel
        w_u = pe * g[t:t + 1, :]                                              # (1, BN)
        xin_u = jnp.dot(expand_e * w_u, p_sel,
                        preferred_element_type=jnp.float32)                   # (B, N)
        denom = jnp.sum(expand_e * pe, axis=-1, keepdims=True)                # (B, 1)
        xin = xin_u * pl.reciprocal(denom, approx=True)                       # (B, N)

        # gates = [xin | h] @ [wih | whh]^T + (bih + bhh) : one MXU push
        xin_h = jnp.concatenate([xin, hc[:, 0:M]], axis=-1)                   # (B, N+M)
        gates = jnp.dot(xin_h, w_catT,
                        preferred_element_type=jnp.float32) + lstm_b          # (B, 4M)
        sig = jax.nn.sigmoid(gates)          # one EUP pass covers i, f, o
        tg = jnp.tanh(gates)                 # one EUP pass covers g
        i_g = sig[:, 0:M]
        f_g = sig[:, M:2 * M]
        g_g = tg[:, 2 * M:3 * M]
        o_g = sig[:, 3 * M:4 * M]
        c_new = f_g * hc[:, M:2 * M] + i_g * g_g
        h_new = o_g * jnp.tanh(c_new)
        hc = jnp.concatenate([h_new, c_new], axis=-1)                         # (B, 2M)

        out_ref[:, t * M:(t + 1) * M] = h_new            # static lane-slice store


# --------------------------- parameter preparation -----------------------------
def prepare_params(params, adj):
    """One-time weight folding / transposes / packing into a single f32 slab."""
    f32 = lambda a: np.asarray(a, dtype=np.float32)
    a_w = f32(params["a_w"])          # (1, F)
    a_b = float(f32(params["a_b"])[0])
    gat_w = f32(params["gat_w"])      # (T, T)
    att_src = f32(params["att_src"])  # (1, T)
    att_dst = f32(params["att_dst"])  # (1, T)
    gat_b = f32(params["gat_b"])      # (T,)
    we_w = f32(params["we_w"])        # (T, 2M)
    we_b = f32(params["we_b"])        # (T,)
    ue_w = f32(params["ue_w"])        # (T, T)
    ve_w = f32(params["ve_w"])        # (1, T)
    wih = f32(params["wih"])          # (4M, N)
    whh = f32(params["whh"])          # (4M, M)
    bih = f32(params["bih"])
    bhh = f32(params["bhh"])
    adj_np = f32(adj)                 # (N, N)

    slab = np.zeros((_SLAB_ROWS, 128), np.float32)

    # Linear-A folded into the GAT weight / bias.
    w_comb = (gat_w[:, :, None] * a_w[0][None, None, :]).reshape(T, TF)
    slab[_R_WCOMB:_R_WCOMB + T, :TF] = w_comb
    slab[_R_WB:_R_WB + T, 0] = a_b * gat_w.sum(axis=1)

    slab[_R_UEW:_R_UEW + T, :T] = ue_w
    slab[_R_ADST:_R_ADST + T, 0] = att_dst[0]
    slab[_R_GATB:_R_GATB + T, 0] = gat_b

    # Block-diagonal additive adjacency mask (0 where edge exists, else -1e30).
    neg = np.float32(-1e30)
    mask = np.full((BN, BN), neg, np.float32)
    blk = np.where(adj_np > 0, np.float32(0.0), neg).astype(np.float32)
    for b in range(B):
        mask[b * N:(b + 1) * N, b * N:(b + 1) * N] = blk
    slab[_R_MASK:_R_MASK + BN, :BN] = mask

    slab[_R_WEWT:_R_WEWT + 2 * M, :T] = we_w.T                       # (2M, T)
    slab[_R_WCAT:_R_WCAT + N + M, :4 * M] = np.concatenate(
        [wih, whh], axis=1).T                                        # (N+M, 4M)
    slab[_R_PSEL:_R_PSEL + BN, :N] = np.tile(
        np.eye(N, dtype=np.float32), (B, 1))                         # (BN, N)

    expand_e = np.zeros((B, BN), np.float32)
    for b in range(B):
        expand_e[b, b * N:(b + 1) * N] = 1.0
    slab[_R_EXP:_R_EXP + B, :BN] = expand_e

    slab[_R_WEB, :T] = we_b
    slab[_R_ASRC, :T] = att_src[0]
    slab[_R_VE, :T] = ve_w[0]
    slab[_R_LSTMB, :4 * M] = bih + bhh
    return jnp.asarray(slab)


# ------------------------------- wrapper ----------------------------------------
@jax.jit
def attention_encoder(inputs, slab):
    # (B, T, N, F) -> (T*F, B*N) lane-contiguous block for the folded GAT matmul.
    x_stacked = jnp.transpose(inputs, (1, 3, 0, 2)).reshape(TF, BN)
    out = pl.pallas_call(
        fused_kernel,
        out_shape=jax.ShapeDtypeStruct((B, T * M), jnp.float32),
        in_specs=[pl.BlockSpec(memory_space=pltpu.MemorySpace.VMEM),
                  pl.BlockSpec(memory_space=pltpu.MemorySpace.VMEM)],
        out_specs=pl.BlockSpec(memory_space=pltpu.MemorySpace.VMEM),
    )(x_stacked, slab)
    return out.reshape(B, T, M)                   # free contiguous reshape


# --------------------------- pure-JAX reference ---------------------------------
def ref_forward(inputs, params, adj):
    proj = jnp.sum(inputs * params["a_w"][0][None, None, None, :], axis=-1) \
        + params["a_b"][0]                                      # (B, T, N)
    x_nodes = jnp.transpose(proj, (0, 2, 1))                    # (B, N, T)
    wx = x_nodes @ params["gat_w"].T                            # (B, N, T)
    a_src = jnp.sum(wx * params["att_src"], axis=-1)            # (B, N)
    a_dst = jnp.sum(wx * params["att_dst"], axis=-1)            # (B, N)
    s = a_dst[:, :, None] + a_src[:, None, :]
    s = jnp.where(s > 0, s, 0.2 * s)
    s = jnp.where(adj[None] > 0, s, -1e30)
    p = jax.nn.softmax(s, axis=-1)
    g = p @ wx + params["gat_b"]                                # (B, N, T)

    m = params["whh"].shape[1]
    y = g @ params["ue_w"].T
    h = jnp.zeros((inputs.shape[0], m), jnp.float32)
    c = jnp.zeros((inputs.shape[0], m), jnp.float32)
    outs = []
    for t in range(inputs.shape[1]):
        xt = jnp.concatenate([h, c], axis=1) @ params["we_w"].T + params["we_b"]
        z = jnp.tanh(xt[:, None, :] + y)
        e = jnp.sum(z * params["ve_w"][None, :, :], axis=-1)
        alpha = jax.nn.softmax(e, axis=1)
        xin = alpha * g[:, :, t]
        gates = xin @ params["wih"].T + params["bih"] + h @ params["whh"].T + params["bhh"]
        i_g = jax.nn.sigmoid(gates[:, 0:m])
        f_g = jax.nn.sigmoid(gates[:, m:2 * m])
        g_g = jnp.tanh(gates[:, 2 * m:3 * m])
        o_g = jax.nn.sigmoid(gates[:, 3 * m:4 * m])
        c = f_g * c + i_g * g_g
        h = o_g * jnp.tanh(c)
        outs.append(h)
    return jnp.stack(outs, axis=1)


# ---------------------------------- main -----------------------------------------
if __name__ == "__main__":
    key = jax.random.PRNGKey(0)
    ks = jax.random.split(key, 16)

    def init(k, shape, scale=0.1):
        return (scale * jax.random.normal(k, shape)).astype(jnp.float32)

    params = {
        # Linear A : F -> 1
        "a_w": init(ks[0], (1, F_FEAT)),
        "a_b": init(ks[1], (1,)),
        # GATConv(T, T, heads=1)
        "gat_w": init(ks[2], (T, T)),
        "att_src": init(ks[3], (1, T)),
        "att_dst": init(ks[4], (1, T)),
        "gat_b": init(ks[5], (T,)),
        # W_e : 2M -> T,  U_e : T -> T (no bias),  v_e : T -> 1 (no bias)
        "we_w": init(ks[6], (T, 2 * M)),
        "we_b": init(ks[7], (T,)),
        "ue_w": init(ks[8], (T, T)),
        "ve_w": init(ks[9], (1, T)),
        # LSTMCell(N, M): gate order i, f, g, o
        "wih": init(ks[10], (4 * M, N)),
        "whh": init(ks[11], (4 * M, M)),
        "bih": init(ks[12], (4 * M,)),
        "bhh": init(ks[13], (4 * M,)),
    }

    # deterministic ring graph over N nodes; adj[dst, src] = 1, with self loops
    adj_np = np.eye(N, dtype=np.float32)
    for j in range(N):
        k = (j + 1) % N
        adj_np[k, j] = 1.0
        adj_np[j, k] = 1.0
    adj = jnp.asarray(adj_np)

    inputs = jax.random.normal(ks[14], (B, T, N, F_FEAT)).astype(jnp.float32)

    slab = prepare_params(params, adj)
    out = jax.block_until_ready(attention_encoder(inputs, slab))
    ref = ref_forward(inputs, params, adj)
    np.testing.assert_allclose(np.asarray(out), np.asarray(ref), atol=2e-3, rtol=2e-3)
    assert out.shape == (B, T, M)
    print("KERNEL_OK")
</pallas_src>

<mosaic_0001>
module attributes {stable_mosaic.version = 11 : i64} {
  func.func @fused_kernel(%arg0: memref<32x32xf32, #tpu.memory_space<vmem>>, %arg1: memref<256x128xf32, #tpu.memory_space<vmem>>, %arg2: memref<2x256xf32, #tpu.memory_space<vmem>>) attributes {dimension_semantics = [], scalar_prefetch = 0 : i64, scratch_operands = 0 : i64, tpu.core_type = #tpu.core_type<tc>} {
    %c0 = arith.constant 0 : index
    %c0_0 = arith.constant 0 : index
    %0 = vector.load %arg1[%c0, %c0_0] : memref<256x128xf32, #tpu.memory_space<vmem>>, vector<8x32xf32>
    %c8 = arith.constant 8 : index
    %c0_1 = arith.constant 0 : index
    %1 = vector.load %arg1[%c8, %c0_1] : memref<256x128xf32, #tpu.memory_space<vmem>>, vector<8x8xf32>
    %c16 = arith.constant 16 : index
    %c0_2 = arith.constant 0 : index
    %2 = vector.load %arg1[%c16, %c0_2] : memref<256x128xf32, #tpu.memory_space<vmem>>, vector<8x1xf32>
    %c24 = arith.constant 24 : index
    %c0_3 = arith.constant 0 : index
    %3 = vector.load %arg1[%c24, %c0_3] : memref<256x128xf32, #tpu.memory_space<vmem>>, vector<8x1xf32>
    %c32 = arith.constant 32 : index
    %c0_4 = arith.constant 0 : index
    %4 = vector.load %arg1[%c32, %c0_4] : memref<256x128xf32, #tpu.memory_space<vmem>>, vector<8x1xf32>
    %c40 = arith.constant 40 : index
    %c0_5 = arith.constant 0 : index
    %5 = vector.load %arg1[%c40, %c0_5] : memref<256x128xf32, #tpu.memory_space<vmem>>, vector<32x32xf32>
    %c72 = arith.constant 72 : index
    %c0_6 = arith.constant 0 : index
    %6 = vector.load %arg1[%c72, %c0_6] : memref<256x128xf32, #tpu.memory_space<vmem>>, vector<64x8xf32>
    %c136 = arith.constant 136 : index
    %c0_7 = arith.constant 0 : index
    %7 = vector.load %arg1[%c136, %c0_7] : memref<256x128xf32, #tpu.memory_space<vmem>>, vector<48x128xf32>
    %c184 = arith.constant 184 : index
    %c0_8 = arith.constant 0 : index
    %8 = vector.load %arg1[%c184, %c0_8] : memref<256x128xf32, #tpu.memory_space<vmem>>, vector<32x16xf32>
    %c216 = arith.constant 216 : index
    %c0_9 = arith.constant 0 : index
    %9 = vector.load %arg1[%c216, %c0_9] : memref<256x128xf32, #tpu.memory_space<vmem>>, vector<2x32xf32>
    %c224 = arith.constant 224 : index
    %c0_10 = arith.constant 0 : index
    %10 = vector.load %arg1[%c224, %c0_10] : memref<256x128xf32, #tpu.memory_space<vmem>>, vector<1x8xf32>
    %c232 = arith.constant 232 : index
    %c0_11 = arith.constant 0 : index
    %11 = vector.load %arg1[%c232, %c0_11] : memref<256x128xf32, #tpu.memory_space<vmem>>, vector<1x8xf32>
    %c240 = arith.constant 240 : index
    %c0_12 = arith.constant 0 : index
    %12 = vector.load %arg1[%c240, %c0_12] : memref<256x128xf32, #tpu.memory_space<vmem>>, vector<1x8xf32>
    %c248 = arith.constant 248 : index
    %c0_13 = arith.constant 0 : index
    %13 = vector.load %arg1[%c248, %c0_13] : memref<256x128xf32, #tpu.memory_space<vmem>>, vector<1x128xf32>
    %c0_14 = arith.constant 0 : index
    %c0_15 = arith.constant 0 : index
    %14 = vector.load %arg0[%c0_14, %c0_15] : memref<32x32xf32, #tpu.memory_space<vmem>>, vector<32x32xf32>
    %cst = arith.constant dense<0.000000e+00> : vector<8x32xf32>
    %15 = tpu.matmul %0, %14, %cst {dimension_numbers = #tpu.dot_dimension_numbers<[1], [0], [0], [1], [0, 0, 1, 1], [], []>} : vector<8x32xf32>, vector<32x32xf32>, vector<8x32xf32> -> vector<8x32xf32>
    %16 = vector.broadcast %3 : vector<8x1xf32> to vector<8x32xf32>
    %17 = arith.addf %15, %16 : vector<8x32xf32>
    %cst_16 = arith.constant dense<0.000000e+00> : vector<1x32xf32>
    %18 = tpu.matmul %11, %17, %cst_16 {dimension_numbers = #tpu.dot_dimension_numbers<[1], [0], [0], [1], [0, 0, 1, 1], [], []>} : vector<1x8xf32>, vector<8x32xf32>, vector<1x32xf32> -> vector<1x32xf32>
    %cst_17 = arith.constant dense<0.000000e+00> : vector<32x1xf32>
    %19 = tpu.matmul %17, %2, %cst_17 {dimension_numbers = #tpu.dot_dimension_numbers<[0], [0], [1], [1], [0, 1, 1, 1], [], []>} : vector<8x32xf32>, vector<8x1xf32>, vector<32x1xf32> -> vector<32x1xf32>
    %20 = vector.broadcast %19 : vector<32x1xf32> to vector<32x32xf32>
    %21 = vector.broadcast %18 : vector<1x32xf32> to vector<32x32xf32>
    %22 = arith.addf %20, %21 : vector<32x32xf32>
    %cst_18 = arith.constant 0.000000e+00 : f32
    %23 = vector.broadcast %cst_18 : f32 to vector<32x32xf32>
    %24 = arith.cmpf ogt, %22, %23 : vector<32x32xf32>
    %cst_19 = arith.constant 2.000000e-01 : f32
    %25 = vector.broadcast %cst_19 : f32 to vector<32x32xf32>
    %26 = arith.mulf %25, %22 : vector<32x32xf32>
    %27 = arith.select %24, %22, %26 : vector<32x32xi1>, vector<32x32xf32>
    %28 = arith.addf %27, %5 : vector<32x32xf32>
    %cst_20 = arith.constant dense<0xFF800000> : vector<32xf32>
    %29 = vector.multi_reduction <maximumf>, %28, %cst_20 [1] : vector<32x32xf32> to vector<32xf32>
    %30 = vector.shape_cast %29 : vector<32xf32> to vector<32x1xf32>
    %31 = vector.broadcast %30 : vector<32x1xf32> to vector<32x32xf32>
    %32 = arith.subf %28, %31 : vector<32x32xf32>
    %33 = math.exp %32 : vector<32x32xf32>
    %cst_21 = arith.constant dense<0.000000e+00> : vector<32xf32>
    %34 = vector.multi_reduction <add>, %33, %cst_21 [1] : vector<32x32xf32> to vector<32xf32>
    %35 = vector.shape_cast %34 : vector<32xf32> to vector<32x1xf32>
    %36 = tpu.reciprocal %35 {approx = true} : vector<32x1xf32> -> vector<32x1xf32>
    %37 = vector.broadcast %36 : vector<32x1xf32> to vector<32x32xf32>
    %38 = arith.mulf %33, %37 : vector<32x32xf32>
    %cst_22 = arith.constant dense<0.000000e+00> : vector<8x32xf32>
    %39 = tpu.matmul %17, %38, %cst_22 {dimension_numbers = #tpu.dot_dimension_numbers<[1], [1], [0], [0], [0, 0, 1, 0], [], []>} : vector<8x32xf32>, vector<32x32xf32>, vector<8x32xf32> -> vector<8x32xf32>
    %40 = vector.broadcast %4 : vector<8x1xf32> to vector<8x32xf32>
    %41 = arith.addf %39, %40 : vector<8x32xf32>
    %cst_23 = arith.constant dense<0.000000e+00> : vector<8x32xf32>
    %42 = tpu.matmul %1, %41, %cst_23 {dimension_numbers = #tpu.dot_dimension_numbers<[1], [0], [0], [1], [0, 0, 1, 1], [], []>} : vector<8x8xf32>, vector<8x32xf32>, vector<8x32xf32> -> vector<8x32xf32>
    %cst_24 = arith.constant 0.000000e+00 : f32
    %43 = vector.broadcast %cst_24 : f32 to vector<2x64xf32>
    %cst_25 = arith.constant dense<0.000000e+00> : vector<2x8xf32>
    %44 = tpu.matmul %43, %6, %cst_25 {dimension_numbers = #tpu.dot_dimension_numbers<[1], [0], [0], [1], [0, 0, 1, 1], [], []>} : vector<2x64xf32>, vector<64x8xf32>, vector<2x8xf32> -> vector<2x8xf32>
    %45 = vector.broadcast %10 : vector<1x8xf32> to vector<2x8xf32>
    %46 = arith.addf %44, %45 : vector<2x8xf32>
    %cst_26 = arith.constant dense<0.000000e+00> : vector<8x32xf32>
    %47 = tpu.matmul %46, %9, %cst_26 {dimension_numbers = #tpu.dot_dimension_numbers<[0], [0], [1], [1], [0, 1, 1, 1], [], []>} : vector<2x8xf32>, vector<2x32xf32>, vector<8x32xf32> -> vector<8x32xf32>
    %48 = arith.addf %47, %42 : vector<8x32xf32>
    %49 = math.tanh %48 : vector<8x32xf32>
    %cst_27 = arith.constant dense<0.000000e+00> : vector<1x32xf32>
    %50 = tpu.matmul %12, %49, %cst_27 {dimension_numbers = #tpu.dot_dimension_numbers<[1], [0], [0], [1], [0, 0, 1, 1], [], []>} : vector<1x8xf32>, vector<8x32xf32>, vector<1x32xf32> -> vector<1x32xf32>
    %51 = math.exp %50 : vector<1x32xf32>
    %52 = vector.extract_strided_slice %41 {offsets = [0, 0], sizes = [1, 32], strides = [1, 1]} : vector<8x32xf32> to vector<1x32xf32>
    %53 = arith.mulf %51, %52 : vector<1x32xf32>
    %54 = vector.broadcast %53 : vector<1x32xf32> to vector<2x32xf32>
    %55 = arith.mulf %9, %54 : vector<2x32xf32>
    %cst_28 = arith.constant dense<0.000000e+00> : vector<2x16xf32>
    %56 = tpu.matmul %55, %8, %cst_28 {dimension_numbers = #tpu.dot_dimension_numbers<[1], [0], [0], [1], [0, 0, 1, 1], [], []>} : vector<2x32xf32>, vector<32x16xf32>, vector<2x16xf32> -> vector<2x16xf32>
    %57 = vector.broadcast %51 : vector<1x32xf32> to vector<2x32xf32>
    %58 = arith.mulf %9, %57 : vector<2x32xf32>
    %cst_29 = arith.constant dense<0.000000e+00> : vector<2xf32>
    %59 = vector.multi_reduction <add>, %58, %cst_29 [1] : vector<2x32xf32> to vector<2xf32>
    %60 = vector.shape_cast %59 : vector<2xf32> to vector<2x1xf32>
    %61 = tpu.reciprocal %60 {approx = true} : vector<2x1xf32> -> vector<2x1xf32>
    %62 = vector.broadcast %61 : vector<2x1xf32> to vector<2x16xf32>
    %63 = arith.mulf %56, %62 : vector<2x16xf32>
    %64 = vector.extract_strided_slice %43 {offsets = [0, 0], sizes = [2, 32], strides = [1, 1]} : vector<2x64xf32> to vector<2x32xf32>
    %65 = tpu.concatenate %63, %64 in 1 : vector<2x16xf32>, vector<2x32xf32> -> vector<2x48xf32>
    %cst_30 = arith.constant dense<0.000000e+00> : vector<2x128xf32>
    %66 = tpu.matmul %65, %7, %cst_30 {dimension_numbers = #tpu.dot_dimension_numbers<[1], [0], [0], [1], [0, 0, 1, 1], [], []>} : vector<2x48xf32>, vector<48x128xf32>, vector<2x128xf32> -> vector<2x128xf32>
    %67 = vector.broadcast %13 : vector<1x128xf32> to vector<2x128xf32>
    %68 = arith.addf %66, %67 : vector<2x128xf32>
    %69 = arith.negf %68 : vector<2x128xf32>
    %70 = math.exp %69 : vector<2x128xf32>
    %cst_31 = arith.constant 1.000000e+00 : f32
    %71 = vector.broadcast %cst_31 : f32 to vector<2x128xf32>
    %72 = arith.addf %71, %70 : vector<2x128xf32>
    %73 = arith.divf %71, %72 : vector<2x128xf32>
    %74 = math.tanh %68 : vector<2x128xf32>
    %75 = vector.extract_strided_slice %73 {offsets = [0, 0], sizes = [2, 32], strides = [1, 1]} : vector<2x128xf32> to vector<2x32xf32>
    %76 = vector.extract_strided_slice %73 {offsets = [0, 32], sizes = [2, 32], strides = [1, 1]} : vector<2x128xf32> to vector<2x32xf32>
    %77 = vector.extract_strided_slice %74 {offsets = [0, 64], sizes = [2, 32], strides = [1, 1]} : vector<2x128xf32> to vector<2x32xf32>
    %78 = vector.extract_strided_slice %73 {offsets = [0, 96], sizes = [2, 32], strides = [1, 1]} : vector<2x128xf32> to vector<2x32xf32>
    %79 = vector.extract_strided_slice %43 {offsets = [0, 32], sizes = [2, 32], strides = [1, 1]} : vector<2x64xf32> to vector<2x32xf32>
    %80 = arith.mulf %76, %79 : vector<2x32xf32>
    %81 = arith.mulf %75, %77 : vector<2x32xf32>
    %82 = arith.addf %80, %81 : vector<2x32xf32>
    %83 = math.tanh %82 : vector<2x32xf32>
    %84 = arith.mulf %78, %83 : vector<2x32xf32>
    %85 = tpu.concatenate %84, %82 in 1 : vector<2x32xf32>, vector<2x32xf32> -> vector<2x64xf32>
    %c0_32 = arith.constant 0 : index
    %c0_33 = arith.constant 0 : index
    %86 = vector.load %arg2[%c0_32, %c0_33] : memref<2x256xf32, #tpu.memory_space<vmem>>, vector<2x32xf32>
    tpu.vector_store %arg2[%c0_32, %c0_33], %84 {strides = array<i32>} : memref<2x256xf32, #tpu.memory_space<vmem>>, vector<2x32xf32>,
    %cst_34 = arith.constant dense<0.000000e+00> : vector<2x8xf32>
    %87 = tpu.matmul %85, %6, %cst_34 {dimension_numbers = #tpu.dot_dimension_numbers<[1], [0], [0], [1], [0, 0, 1, 1], [], []>} : vector<2x64xf32>, vector<64x8xf32>, vector<2x8xf32> -> vector<2x8xf32>
    %88 = vector.broadcast %10 : vector<1x8xf32> to vector<2x8xf32>
    %89 = arith.addf %87, %88 : vector<2x8xf32>
    %cst_35 = arith.constant dense<0.000000e+00> : vector<8x32xf32>
    %90 = tpu.matmul %89, %9, %cst_35 {dimension_numbers = #tpu.dot_dimension_numbers<[0], [0], [1], [1], [0, 1, 1, 1], [], []>} : vector<2x8xf32>, vector<2x32xf32>, vector<8x32xf32> -> vector<8x32xf32>
    %91 = arith.addf %90, %42 : vector<8x32xf32>
    %92 = math.tanh %91 : vector<8x32xf32>
    %cst_36 = arith.constant dense<0.000000e+00> : vector<1x32xf32>
    %93 = tpu.matmul %12, %92, %cst_36 {dimension_numbers = #tpu.dot_dimension_numbers<[1], [0], [0], [1], [0, 0, 1, 1], [], []>} : vector<1x8xf32>, vector<8x32xf32>, vector<1x32xf32> -> vector<1x32xf32>
    %94 = math.exp %93 : vector<1x32xf32>
    %95 = vector.extract_strided_slice %41 {offsets = [1, 0], sizes = [1, 32], strides = [1, 1]} : vector<8x32xf32> to vector<1x32xf32>
    %96 = arith.mulf %94, %95 : vector<1x32xf32>
    %97 = vector.broadcast %96 : vector<1x32xf32> to vector<2x32xf32>
    %98 = arith.mulf %9, %97 : vector<2x32xf32>
    %cst_37 = arith.constant dense<0.000000e+00> : vector<2x16xf32>
    %99 = tpu.matmul %98, %8, %cst_37 {dimension_numbers = #tpu.dot_dimension_numbers<[1], [0], [0], [1], [0, 0, 1, 1], [], []>} : vector<2x32xf32>, vector<32x16xf32>, vector<2x16xf32> -> vector<2x16xf32>
    %100 = vector.broadcast %94 : vector<1x32xf32> to vector<2x32xf32>
    %101 = arith.mulf %9, %100 : vector<2x32xf32>
    %cst_38 = arith.constant dense<0.000000e+00> : vector<2xf32>
    %102 = vector.multi_reduction <add>, %101, %cst_38 [1] : vector<2x32xf32> to vector<2xf32>
    %103 = vector.shape_cast %102 : vector<2xf32> to vector<2x1xf32>
    %104 = tpu.reciprocal %103 {approx = true} : vector<2x1xf32> -> vector<2x1xf32>
    %105 = vector.broadcast %104 : vector<2x1xf32> to vector<2x16xf32>
    %106 = arith.mulf %99, %105 : vector<2x16xf32>
    %107 = vector.extract_strided_slice %85 {offsets = [0, 0], sizes = [2, 32], strides = [1, 1]} : vector<2x64xf32> to vector<2x32xf32>
    %108 = tpu.concatenate %106, %107 in 1 : vector<2x16xf32>, vector<2x32xf32> -> vector<2x48xf32>
    %cst_39 = arith.constant dense<0.000000e+00> : vector<2x128xf32>
    %109 = tpu.matmul %108, %7, %cst_39 {dimension_numbers = #tpu.dot_dimension_numbers<[1], [0], [0], [1], [0, 0, 1, 1], [], []>} : vector<2x48xf32>, vector<48x128xf32>, vector<2x128xf32> -> vector<2x128xf32>
    %110 = vector.broadcast %13 : vector<1x128xf32> to vector<2x128xf32>
    %111 = arith.addf %109, %110 : vector<2x128xf32>
    %112 = arith.negf %111 : vector<2x128xf32>
    %113 = math.exp %112 : vector<2x128xf32>
    %cst_40 = arith.constant 1.000000e+00 : f32
    %114 = vector.broadcast %cst_40 : f32 to vector<2x128xf32>
    %115 = arith.addf %114, %113 : vector<2x128xf32>
    %116 = arith.divf %114, %115 : vector<2x128xf32>
    %117 = math.tanh %111 : vector<2x128xf32>
    %118 = vector.extract_strided_slice %116 {offsets = [0, 0], sizes = [2, 32], strides = [1, 1]} : vector<2x128xf32> to vector<2x32xf32>
    %119 = vector.extract_strided_slice %116 {offsets = [0, 32], sizes = [2, 32], strides = [1, 1]} : vector<2x128xf32> to vector<2x32xf32>
    %120 = vector.extract_strided_slice %117 {offsets = [0, 64], sizes = [2, 32], strides = [1, 1]} : vector<2x128xf32> to vector<2x32xf32>
    %121 = vector.extract_strided_slice %116 {offsets = [0, 96], sizes = [2, 32], strides = [1, 1]} : vector<2x128xf32> to vector<2x32xf32>
    %122 = vector.extract_strided_slice %85 {offsets = [0, 32], sizes = [2, 32], strides = [1, 1]} : vector<2x64xf32> to vector<2x32xf32>
    %123 = arith.mulf %119, %122 : vector<2x32xf32>
    %124 = arith.mulf %118, %120 : vector<2x32xf32>
    %125 = arith.addf %123, %124 : vector<2x32xf32>
    %126 = math.tanh %125 : vector<2x32xf32>
    %127 = arith.mulf %121, %126 : vector<2x32xf32>
    %128 = tpu.concatenate %127, %125 in 1 : vector<2x32xf32>, vector<2x32xf32> -> vector<2x64xf32>
    %c0_41 = arith.constant 0 : index
    %c32_42 = arith.constant 32 : index
    %129 = vector.load %arg2[%c0_41, %c32_42] : memref<2x256xf32, #tpu.memory_space<vmem>>, vector<2x32xf32>
    tpu.vector_store %arg2[%c0_41, %c32_42], %127 {strides = array<i32>} : memref<2x256xf32, #tpu.memory_space<vmem>>, vector<2x32xf32>,
    %cst_43 = arith.constant dense<0.000000e+00> : vector<2x8xf32>
    %130 = tpu.matmul %128, %6, %cst_43 {dimension_numbers = #tpu.dot_dimension_numbers<[1], [0], [0], [1], [0, 0, 1, 1], [], []>} : vector<2x64xf32>, vector<64x8xf32>, vector<2x8xf32> -> vector<2x8xf32>
    %131 = vector.broadcast %10 : vector<1x8xf32> to vector<2x8xf32>
    %132 = arith.addf %130, %131 : vector<2x8xf32>
    %cst_44 = arith.constant dense<0.000000e+00> : vector<8x32xf32>
    %133 = tpu.matmul %132, %9, %cst_44 {dimension_numbers = #tpu.dot_dimension_numbers<[0], [0], [1], [1], [0, 1, 1, 1], [], []>} : vector<2x8xf32>, vector<2x32xf32>, vector<8x32xf32> -> vector<8x32xf32>
    %134 = arith.addf %133, %42 : vector<8x32xf32>
    %135 = math.tanh %134 : vector<8x32xf32>
    %cst_45 = arith.constant dense<0.000000e+00> : vector<1x32xf32>
    %136 = tpu.matmul %12, %135, %cst_45 {dimension_numbers = #tpu.dot_dimension_numbers<[1], [0], [0], [1], [0, 0, 1, 1], [], []>} : vector<1x8xf32>, vector<8x32xf32>, vector<1x32xf32> -> vector<1x32xf32>
    %137 = math.exp %136 : vector<1x32xf32>
    %138 = vector.extract_strided_slice %41 {offsets = [2, 0], sizes = [1, 32], strides = [1, 1]} : vector<8x32xf32> to vector<1x32xf32>
    %139 = arith.mulf %137, %138 : vector<1x32xf32>
    %140 = vector.broadcast %139 : vector<1x32xf32> to vector<2x32xf32>
    %141 = arith.mulf %9, %140 : vector<2x32xf32>
    %cst_46 = arith.constant dense<0.000000e+00> : vector<2x16xf32>
    %142 = tpu.matmul %141, %8, %cst_46 {dimension_numbers = #tpu.dot_dimension_numbers<[1], [0], [0], [1], [0, 0, 1, 1], [], []>} : vector<2x32xf32>, vector<32x16xf32>, vector<2x16xf32> -> vector<2x16xf32>
    %143 = vector.broadcast %137 : vector<1x32xf32> to vector<2x32xf32>
    %144 = arith.mulf %9, %143 : vector<2x32xf32>
    %cst_47 = arith.constant dense<0.000000e+00> : vector<2xf32>
    %145 = vector.multi_reduction <add>, %144, %cst_47 [1] : vector<2x32xf32> to vector<2xf32>
    %146 = vector.shape_cast %145 : vector<2xf32> to vector<2x1xf32>
    %147 = tpu.reciprocal %146 {approx = true} : vector<2x1xf32> -> vector<2x1xf32>
    %148 = vector.broadcast %147 : vector<2x1xf32> to vector<2x16xf32>
    %149 = arith.mulf %142, %148 : vector<2x16xf32>
    %150 = vector.extract_strided_slice %128 {offsets = [0, 0], sizes = [2, 32], strides = [1, 1]} : vector<2x64xf32> to vector<2x32xf32>
    %151 = tpu.concatenate %149, %150 in 1 : vector<2x16xf32>, vector<2x32xf32> -> vector<2x48xf32>
    %cst_48 = arith.constant dense<0.000000e+00> : vector<2x128xf32>
    %152 = tpu.matmul %151, %7, %cst_48 {dimension_numbers = #tpu.dot_dimension_numbers<[1], [0], [0], [1], [0, 0, 1, 1], [], []>} : vector<2x48xf32>, vector<48x128xf32>, vector<2x128xf32> -> vector<2x128xf32>
    %153 = vector.broadcast %13 : vector<1x128xf32> to vector<2x128xf32>
    %154 = arith.addf %152, %153 : vector<2x128xf32>
    %155 = arith.negf %154 : vector<2x128xf32>
    %156 = math.exp %155 : vector<2x128xf32>
    %cst_49 = arith.constant 1.000000e+00 : f32
    %157 = vector.broadcast %cst_49 : f32 to vector<2x128xf32>
    %158 = arith.addf %157, %156 : vector<2x128xf32>
    %159 = arith.divf %157, %158 : vector<2x128xf32>
    %160 = math.tanh %154 : vector<2x128xf32>
    %161 = vector.extract_strided_slice %159 {offsets = [0, 0], sizes = [2, 32], strides = [1, 1]} : vector<2x128xf32> to vector<2x32xf32>
    %162 = vector.extract_strided_slice %159 {offsets = [0, 32], sizes = [2, 32], strides = [1, 1]} : vector<2x128xf32> to vector<2x32xf32>
    %163 = vector.extract_strided_slice %160 {offsets = [0, 64], sizes = [2, 32], strides = [1, 1]} : vector<2x128xf32> to vector<2x32xf32>
    %164 = vector.extract_strided_slice %159 {offsets = [0, 96], sizes = [2, 32], strides = [1, 1]} : vector<2x128xf32> to vector<2x32xf32>
    %165 = vector.extract_strided_slice %128 {offsets = [0, 32], sizes = [2, 32], strides = [1, 1]} : vector<2x64xf32> to vector<2x32xf32>
    %166 = arith.mulf %162, %165 : vector<2x32xf32>
    %167 = arith.mulf %161, %163 : vector<2x32xf32>
    %168 = arith.addf %166, %167 : vector<2x32xf32>
    %169 = math.tanh %168 : vector<2x32xf32>
    %170 = arith.mulf %164, %169 : vector<2x32xf32>
    %171 = tpu.concatenate %170, %168 in 1 : vector<2x32xf32>, vector<2x32xf32> -> vector<2x64xf32>
    %c0_50 = arith.constant 0 : index
    %c64 = arith.constant 64 : index
    %172 = vector.load %arg2[%c0_50, %c64] : memref<2x256xf32, #tpu.memory_space<vmem>>, vector<2x32xf32>
    tpu.vector_store %arg2[%c0_50, %c64], %170 {strides = array<i32>} : memref<2x256xf32, #tpu.memory_space<vmem>>, vector<2x32xf32>,
    %cst_51 = arith.constant dense<0.000000e+00> : vector<2x8xf32>
    %173 = tpu.matmul %171, %6, %cst_51 {dimension_numbers = #tpu.dot_dimension_numbers<[1], [0], [0], [1], [0, 0, 1, 1], [], []>} : vector<2x64xf32>, vector<64x8xf32>, vector<2x8xf32> -> vector<2x8xf32>
    %174 = vector.broadcast %10 : vector<1x8xf32> to vector<2x8xf32>
    %175 = arith.addf %173, %174 : vector<2x8xf32>
    %cst_52 = arith.constant dense<0.000000e+00> : vector<8x32xf32>
    %176 = tpu.matmul %175, %9, %cst_52 {dimension_numbers = #tpu.dot_dimension_numbers<[0], [0], [1], [1], [0, 1, 1, 1], [], []>} : vector<2x8xf32>, vector<2x32xf32>, vector<8x32xf32> -> vector<8x32xf32>
    %177 = arith.addf %176, %42 : vector<8x32xf32>
    %178 = math.tanh %177 : vector<8x32xf32>
    %cst_53 = arith.constant dense<0.000000e+00> : vector<1x32xf32>
    %179 = tpu.matmul %12, %178, %cst_53 {dimension_numbers = #tpu.dot_dimension_numbers<[1], [0], [0], [1], [0, 0, 1, 1], [], []>} : vector<1x8xf32>, vector<8x32xf32>, vector<1x32xf32> -> vector<1x32xf32>
    %180 = math.exp %179 : vector<1x32xf32>
    %181 = vector.extract_strided_slice %41 {offsets = [3, 0], sizes = [1, 32], strides = [1, 1]} : vector<8x32xf32> to vector<1x32xf32>
    %182 = arith.mulf %180, %181 : vector<1x32xf32>
    %183 = vector.broadcast %182 : vector<1x32xf32> to vector<2x32xf32>
    %184 = arith.mulf %9, %183 : vector<2x32xf32>
    %cst_54 = arith.constant dense<0.000000e+00> : vector<2x16xf32>
    %185 = tpu.matmul %184, %8, %cst_54 {dimension_numbers = #tpu.dot_dimension_numbers<[1], [0], [0], [1], [0, 0, 1, 1], [], []>} : vector<2x32xf32>, vector<32x16xf32>, vector<2x16xf32> -> vector<2x16xf32>
    %186 = vector.broadcast %180 : vector<1x32xf32> to vector<2x32xf32>
    %187 = arith.mulf %9, %186 : vector<2x32xf32>
    %cst_55 = arith.constant dense<0.000000e+00> : vector<2xf32>
    %188 = vector.multi_reduction <add>, %187, %cst_55 [1] : vector<2x32xf32> to vector<2xf32>
    %189 = vector.shape_cast %188 : vector<2xf32> to vector<2x1xf32>
    %190 = tpu.reciprocal %189 {approx = true} : vector<2x1xf32> -> vector<2x1xf32>
    %191 = vector.broadcast %190 : vector<2x1xf32> to vector<2x16xf32>
    %192 = arith.mulf %185, %191 : vector<2x16xf32>
    %193 = vector.extract_strided_slice %171 {offsets = [0, 0], sizes = [2, 32], strides = [1, 1]} : vector<2x64xf32> to vector<2x32xf32>
    %194 = tpu.concatenate %192, %193 in 1 : vector<2x16xf32>, vector<2x32xf32> -> vector<2x48xf32>
    %cst_56 = arith.constant dense<0.000000e+00> : vector<2x128xf32>
    %195 = tpu.matmul %194, %7, %cst_56 {dimension_numbers = #tpu.dot_dimension_numbers<[1], [0], [0], [1], [0, 0, 1, 1], [], []>} : vector<2x48xf32>, vector<48x128xf32>, vector<2x128xf32> -> vector<2x128xf32>
    %196 = vector.broadcast %13 : vector<1x128xf32> to vector<2x128xf32>
    %197 = arith.addf %195, %196 : vector<2x128xf32>
    %198 = arith.negf %197 : vector<2x128xf32>
    %199 = math.exp %198 : vector<2x128xf32>
    %cst_57 = arith.constant 1.000000e+00 : f32
    %200 = vector.broadcast %cst_57 : f32 to vector<2x128xf32>
    %201 = arith.addf %200, %199 : vector<2x128xf32>
    %202 = arith.divf %200, %201 : vector<2x128xf32>
    %203 = math.tanh %197 : vector<2x128xf32>
    %204 = vector.extract_strided_slice %202 {offsets = [0, 0], sizes = [2, 32], strides = [1, 1]} : vector<2x128xf32> to vector<2x32xf32>
    %205 = vector.extract_strided_slice %202 {offsets = [0, 32], sizes = [2, 32], strides = [1, 1]} : vector<2x128xf32> to vector<2x32xf32>
    %206 = vector.extract_strided_slice %203 {offsets = [0, 64], sizes = [2, 32], strides = [1, 1]} : vector<2x128xf32> to vector<2x32xf32>
    %207 = vector.extract_strided_slice %202 {offsets = [0, 96], sizes = [2, 32], strides = [1, 1]} : vector<2x128xf32> to vector<2x32xf32>
    %208 = vector.extract_strided_slice %171 {offsets = [0, 32], sizes = [2, 32], strides = [1, 1]} : vector<2x64xf32> to vector<2x32xf32>
    %209 = arith.mulf %205, %208 : vector<2x32xf32>
    %210 = arith.mulf %204, %206 : vector<2x32xf32>
    %211 = arith.addf %209, %210 : vector<2x32xf32>
    %212 = math.tanh %211 : vector<2x32xf32>
    %213 = arith.mulf %207, %212 : vector<2x32xf32>
    %214 = tpu.concatenate %213, %211 in 1 : vector<2x32xf32>, vector<2x32xf32> -> vector<2x64xf32>
    %c0_58 = arith.constant 0 : index
    %c96 = arith.constant 96 : index
    %215 = vector.load %arg2[%c0_58, %c96] : memref<2x256xf32, #tpu.memory_space<vmem>>, vector<2x32xf32>
    tpu.vector_store %arg2[%c0_58, %c96], %213 {strides = array<i32>} : memref<2x256xf32, #tpu.memory_space<vmem>>, vector<2x32xf32>,
    %cst_59 = arith.constant dense<0.000000e+00> : vector<2x8xf32>
    %216 = tpu.matmul %214, %6, %cst_59 {dimension_numbers = #tpu.dot_dimension_numbers<[1], [0], [0], [1], [0, 0, 1, 1], [], []>} : vector<2x64xf32>, vector<64x8xf32>, vector<2x8xf32> -> vector<2x8xf32>
    %217 = vector.broadcast %10 : vector<1x8xf32> to vector<2x8xf32>
    %218 = arith.addf %216, %217 : vector<2x8xf32>
    %cst_60 = arith.constant dense<0.000000e+00> : vector<8x32xf32>
    %219 = tpu.matmul %218, %9, %cst_60 {dimension_numbers = #tpu.dot_dimension_numbers<[0], [0], [1], [1], [0, 1, 1, 1], [], []>} : vector<2x8xf32>, vector<2x32xf32>, vector<8x32xf32> -> vector<8x32xf32>
    %220 = arith.addf %219, %42 : vector<8x32xf32>
    %221 = math.tanh %220 : vector<8x32xf32>
    %cst_61 = arith.constant dense<0.000000e+00> : vector<1x32xf32>
    %222 = tpu.matmul %12, %221, %cst_61 {dimension_numbers = #tpu.dot_dimension_numbers<[1], [0], [0], [1], [0, 0, 1, 1], [], []>} : vector<1x8xf32>, vector<8x32xf32>, vector<1x32xf32> -> vector<1x32xf32>
    %223 = math.exp %222 : vector<1x32xf32>
    %224 = vector.extract_strided_slice %41 {offsets = [4, 0], sizes = [1, 32], strides = [1, 1]} : vector<8x32xf32> to vector<1x32xf32>
    %225 = arith.mulf %223, %224 : vector<1x32xf32>
    %226 = vector.broadcast %225 : vector<1x32xf32> to vector<2x32xf32>
    %227 = arith.mulf %9, %226 : vector<2x32xf32>
    %cst_62 = arith.constant dense<0.000000e+00> : vector<2x16xf32>
    %228 = tpu.matmul %227, %8, %cst_62 {dimension_numbers = #tpu.dot_dimension_numbers<[1], [0], [0], [1], [0, 0, 1, 1], [], []>} : vector<2x32xf32>, vector<32x16xf32>, vector<2x16xf32> -> vector<2x16xf32>
    %229 = vector.broadcast %223 : vector<1x32xf32> to vector<2x32xf32>
    %230 = arith.mulf %9, %229 : vector<2x32xf32>
    %cst_63 = arith.constant dense<0.000000e+00> : vector<2xf32>
    %231 = vector.multi_reduction <add>, %230, %cst_63 [1] : vector<2x32xf32> to vector<2xf32>
    %232 = vector.shape_cast %231 : vector<2xf32> to vector<2x1xf32>
    %233 = tpu.reciprocal %232 {approx = true} : vector<2x1xf32> -> vector<2x1xf32>
    %234 = vector.broadcast %233 : vector<2x1xf32> to vector<2x16xf32>
    %235 = arith.mulf %228, %234 : vector<2x16xf32>
    %236 = vector.extract_strided_slice %214 {offsets = [0, 0], sizes = [2, 32], strides = [1, 1]} : vector<2x64xf32> to vector<2x32xf32>
    %237 = tpu.concatenate %235, %236 in 1 : vector<2x16xf32>, vector<2x32xf32> -> vector<2x48xf32>
    %cst_64 = arith.constant dense<0.000000e+00> : vector<2x128xf32>
    %238 = tpu.matmul %237, %7, %cst_64 {dimension_numbers = #tpu.dot_dimension_numbers<[1], [0], [0], [1], [0, 0, 1, 1], [], []>} : vector<2x48xf32>, vector<48x128xf32>, vector<2x128xf32> -> vector<2x128xf32>
    %239 = vector.broadcast %13 : vector<1x128xf32> to vector<2x128xf32>
    %240 = arith.addf %238, %239 : vector<2x128xf32>
    %241 = arith.negf %240 : vector<2x128xf32>
    %242 = math.exp %241 : vector<2x128xf32>
    %cst_65 = arith.constant 1.000000e+00 : f32
    %243 = vector.broadcast %cst_65 : f32 to vector<2x128xf32>
    %244 = arith.addf %243, %242 : vector<2x128xf32>
    %245 = arith.divf %243, %244 : vector<2x128xf32>
    %246 = math.tanh %240 : vector<2x128xf32>
    %247 = vector.extract_strided_slice %245 {offsets = [0, 0], sizes = [2, 32], strides = [1, 1]} : vector<2x128xf32> to vector<2x32xf32>
    %248 = vector.extract_strided_slice %245 {offsets = [0, 32], sizes = [2, 32], strides = [1, 1]} : vector<2x128xf32> to vector<2x32xf32>
    %249 = vector.extract_strided_slice %246 {offsets = [0, 64], sizes = [2, 32], strides = [1, 1]} : vector<2x128xf32> to vector<2x32xf32>
    %250 = vector.extract_strided_slice %245 {offsets = [0, 96], sizes = [2, 32], strides = [1, 1]} : vector<2x128xf32> to vector<2x32xf32>
    %251 = vector.extract_strided_slice %214 {offsets = [0, 32], sizes = [2, 32], strides = [1, 1]} : vector<2x64xf32> to vector<2x32xf32>
    %252 = arith.mulf %248, %251 : vector<2x32xf32>
    %253 = arith.mulf %247, %249 : vector<2x32xf32>
    %254 = arith.addf %252, %253 : vector<2x32xf32>
    %255 = math.tanh %254 : vector<2x32xf32>
    %256 = arith.mulf %250, %255 : vector<2x32xf32>
    %257 = tpu.concatenate %256, %254 in 1 : vector<2x32xf32>, vector<2x32xf32> -> vector<2x64xf32>
    %c0_66 = arith.constant 0 : index
    %c128 = arith.constant 128 : index
    %258 = vector.load %arg2[%c0_66, %c128] : memref<2x256xf32, #tpu.memory_space<vmem>>, vector<2x32xf32>
    tpu.vector_store %arg2[%c0_66, %c128], %256 {strides = array<i32>} : memref<2x256xf32, #tpu.memory_space<vmem>>, vector<2x32xf32>,
    %cst_67 = arith.constant dense<0.000000e+00> : vector<2x8xf32>
    %259 = tpu.matmul %257, %6, %cst_67 {dimension_numbers = #tpu.dot_dimension_numbers<[1], [0], [0], [1], [0, 0, 1, 1], [], []>} : vector<2x64xf32>, vector<64x8xf32>, vector<2x8xf32> -> vector<2x8xf32>
    %260 = vector.broadcast %10 : vector<1x8xf32> to vector<2x8xf32>
    %261 = arith.addf %259, %260 : vector<2x8xf32>
    %cst_68 = arith.constant dense<0.000000e+00> : vector<8x32xf32>
    %262 = tpu.matmul %261, %9, %cst_68 {dimension_numbers = #tpu.dot_dimension_numbers<[0], [0], [1], [1], [0, 1, 1, 1], [], []>} : vector<2x8xf32>, vector<2x32xf32>, vector<8x32xf32> -> vector<8x32xf32>
    %263 = arith.addf %262, %42 : vector<8x32xf32>
    %264 = math.tanh %263 : vector<8x32xf32>
    %cst_69 = arith.constant dense<0.000000e+00> : vector<1x32xf32>
    %265 = tpu.matmul %12, %264, %cst_69 {dimension_numbers = #tpu.dot_dimension_numbers<[1], [0], [0], [1], [0, 0, 1, 1], [], []>} : vector<1x8xf32>, vector<8x32xf32>, vector<1x32xf32> -> vector<1x32xf32>
    %266 = math.exp %265 : vector<1x32xf32>
    %267 = vector.extract_strided_slice %41 {offsets = [5, 0], sizes = [1, 32], strides = [1, 1]} : vector<8x32xf32> to vector<1x32xf32>
    %268 = arith.mulf %266, %267 : vector<1x32xf32>
    %269 = vector.broadcast %268 : vector<1x32xf32> to vector<2x32xf32>
    %270 = arith.mulf %9, %269 : vector<2x32xf32>
    %cst_70 = arith.constant dense<0.000000e+00> : vector<2x16xf32>
    %271 = tpu.matmul %270, %8, %cst_70 {dimension_numbers = #tpu.dot_dimension_numbers<[1], [0], [0], [1], [0, 0, 1, 1], [], []>} : vector<2x32xf32>, vector<32x16xf32>, vector<2x16xf32> -> vector<2x16xf32>
    %272 = vector.broadcast %266 : vector<1x32xf32> to vector<2x32xf32>
    %273 = arith.mulf %9, %272 : vector<2x32xf32>
    %cst_71 = arith.constant dense<0.000000e+00> : vector<2xf32>
    %274 = vector.multi_reduction <add>, %273, %cst_71 [1] : vector<2x32xf32> to vector<2xf32>
    %275 = vector.shape_cast %274 : vector<2xf32> to vector<2x1xf32>
    %276 = tpu.reciprocal %275 {approx = true} : vector<2x1xf32> -> vector<2x1xf32>
    %277 = vector.broadcast %276 : vector<2x1xf32> to vector<2x16xf32>
    %278 = arith.mulf %271, %277 : vector<2x16xf32>
    %279 = vector.extract_strided_slice %257 {offsets = [0, 0], sizes = [2, 32], strides = [1, 1]} : vector<2x64xf32> to vector<2x32xf32>
    %280 = tpu.concatenate %278, %279 in 1 : vector<2x16xf32>, vector<2x32xf32> -> vector<2x48xf32>
    %cst_72 = arith.constant dense<0.000000e+00> : vector<2x128xf32>
    %281 = tpu.matmul %280, %7, %cst_72 {dimension_numbers = #tpu.dot_dimension_numbers<[1], [0], [0], [1], [0, 0, 1, 1], [], []>} : vector<2x48xf32>, vector<48x128xf32>, vector<2x128xf32> -> vector<2x128xf32>
    %282 = vector.broadcast %13 : vector<1x128xf32> to vector<2x128xf32>
    %283 = arith.addf %281, %282 : vector<2x128xf32>
    %284 = arith.negf %283 : vector<2x128xf32>
    %285 = math.exp %284 : vector<2x128xf32>
    %cst_73 = arith.constant 1.000000e+00 : f32
    %286 = vector.broadcast %cst_73 : f32 to vector<2x128xf32>
    %287 = arith.addf %286, %285 : vector<2x128xf32>
    %288 = arith.divf %286, %287 : vector<2x128xf32>
    %289 = math.tanh %283 : vector<2x128xf32>
    %290 = vector.extract_strided_slice %288 {offsets = [0, 0], sizes = [2, 32], strides = [1, 1]} : vector<2x128xf32> to vector<2x32xf32>
    %291 = vector.extract_strided_slice %288 {offsets = [0, 32], sizes = [2, 32], strides = [1, 1]} : vector<2x128xf32> to vector<2x32xf32>
    %292 = vector.extract_strided_slice %289 {offsets = [0, 64], sizes = [2, 32], strides = [1, 1]} : vector<2x128xf32> to vector<2x32xf32>
    %293 = vector.extract_strided_slice %288 {offsets = [0, 96], sizes = [2, 32], strides = [1, 1]} : vector<2x128xf32> to vector<2x32xf32>
    %294 = vector.extract_strided_slice %257 {offsets = [0, 32], sizes = [2, 32], strides = [1, 1]} : vector<2x64xf32> to vector<2x32xf32>
    %295 = arith.mulf %291, %294 : vector<2x32xf32>
    %296 = arith.mulf %290, %292 : vector<2x32xf32>
    %297 = arith.addf %295, %296 : vector<2x32xf32>
    %298 = math.tanh %297 : vector<2x32xf32>
    %299 = arith.mulf %293, %298 : vector<2x32xf32>
    %300 = tpu.concatenate %299, %297 in 1 : vector<2x32xf32>, vector<2x32xf32> -> vector<2x64xf32>
    %c0_74 = arith.constant 0 : index
    %c160 = arith.constant 160 : index
    %301 = vector.load %arg2[%c0_74, %c160] : memref<2x256xf32, #tpu.memory_space<vmem>>, vector<2x32xf32>
    tpu.vector_store %arg2[%c0_74, %c160], %299 {strides = array<i32>} : memref<2x256xf32, #tpu.memory_space<vmem>>, vector<2x32xf32>,
    %cst_75 = arith.constant dense<0.000000e+00> : vector<2x8xf32>
    %302 = tpu.matmul %300, %6, %cst_75 {dimension_numbers = #tpu.dot_dimension_numbers<[1], [0], [0], [1], [0, 0, 1, 1], [], []>} : vector<2x64xf32>, vector<64x8xf32>, vector<2x8xf32> -> vector<2x8xf32>
    %303 = vector.broadcast %10 : vector<1x8xf32> to vector<2x8xf32>
    %304 = arith.addf %302, %303 : vector<2x8xf32>
    %cst_76 = arith.constant dense<0.000000e+00> : vector<8x32xf32>
    %305 = tpu.matmul %304, %9, %cst_76 {dimension_numbers = #tpu.dot_dimension_numbers<[0], [0], [1], [1], [0, 1, 1, 1], [], []>} : vector<2x8xf32>, vector<2x32xf32>, vector<8x32xf32> -> vector<8x32xf32>
    %306 = arith.addf %305, %42 : vector<8x32xf32>
    %307 = math.tanh %306 : vector<8x32xf32>
    %cst_77 = arith.constant dense<0.000000e+00> : vector<1x32xf32>
    %308 = tpu.matmul %12, %307, %cst_77 {dimension_numbers = #tpu.dot_dimension_numbers<[1], [0], [0], [1], [0, 0, 1, 1], [], []>} : vector<1x8xf32>, vector<8x32xf32>, vector<1x32xf32> -> vector<1x32xf32>
    %309 = math.exp %308 : vector<1x32xf32>
    %310 = vector.extract_strided_slice %41 {offsets = [6, 0], sizes = [1, 32], strides = [1, 1]} : vector<8x32xf32> to vector<1x32xf32>
    %311 = arith.mulf %309, %310 : vector<1x32xf32>
    %312 = vector.broadcast %311 : vector<1x32xf32> to vector<2x32xf32>
    %313 = arith.mulf %9, %312 : vector<2x32xf32>
    %cst_78 = arith.constant dense<0.000000e+00> : vector<2x16xf32>
    %314 = tpu.matmul %313, %8, %cst_78 {dimension_numbers = #tpu.dot_dimension_numbers<[1], [0], [0], [1], [0, 0, 1, 1], [], []>} : vector<2x32xf32>, vector<32x16xf32>, vector<2x16xf32> -> vector<2x16xf32>
    %315 = vector.broadcast %309 : vector<1x32xf32> to vector<2x32xf32>
    %316 = arith.mulf %9, %315 : vector<2x32xf32>
    %cst_79 = arith.constant dense<0.000000e+00> : vector<2xf32>
    %317 = vector.multi_reduction <add>, %316, %cst_79 [1] : vector<2x32xf32> to vector<2xf32>
    %318 = vector.shape_cast %317 : vector<2xf32> to vector<2x1xf32>
    %319 = tpu.reciprocal %318 {approx = true} : vector<2x1xf32> -> vector<2x1xf32>
    %320 = vector.broadcast %319 : vector<2x1xf32> to vector<2x16xf32>
    %321 = arith.mulf %314, %320 : vector<2x16xf32>
    %322 = vector.extract_strided_slice %300 {offsets = [0, 0], sizes = [2, 32], strides = [1, 1]} : vector<2x64xf32> to vector<2x32xf32>
    %323 = tpu.concatenate %321, %322 in 1 : vector<2x16xf32>, vector<2x32xf32> -> vector<2x48xf32>
    %cst_80 = arith.constant dense<0.000000e+00> : vector<2x128xf32>
    %324 = tpu.matmul %323, %7, %cst_80 {dimension_numbers = #tpu.dot_dimension_numbers<[1], [0], [0], [1], [0, 0, 1, 1], [], []>} : vector<2x48xf32>, vector<48x128xf32>, vector<2x128xf32> -> vector<2x128xf32>
    %325 = vector.broadcast %13 : vector<1x128xf32> to vector<2x128xf32>
    %326 = arith.addf %324, %325 : vector<2x128xf32>
    %327 = arith.negf %326 : vector<2x128xf32>
    %328 = math.exp %327 : vector<2x128xf32>
    %cst_81 = arith.constant 1.000000e+00 : f32
    %329 = vector.broadcast %cst_81 : f32 to vector<2x128xf32>
    %330 = arith.addf %329, %328 : vector<2x128xf32>
    %331 = arith.divf %329, %330 : vector<2x128xf32>
    %332 = math.tanh %326 : vector<2x128xf32>
    %333 = vector.extract_strided_slice %331 {offsets = [0, 0], sizes = [2, 32], strides = [1, 1]} : vector<2x128xf32> to vector<2x32xf32>
    %334 = vector.extract_strided_slice %331 {offsets = [0, 32], sizes = [2, 32], strides = [1, 1]} : vector<2x128xf32> to vector<2x32xf32>
    %335 = vector.extract_strided_slice %332 {offsets = [0, 64], sizes = [2, 32], strides = [1, 1]} : vector<2x128xf32> to vector<2x32xf32>
    %336 = vector.extract_strided_slice %331 {offsets = [0, 96], sizes = [2, 32], strides = [1, 1]} : vector<2x128xf32> to vector<2x32xf32>
    %337 = vector.extract_strided_slice %300 {offsets = [0, 32], sizes = [2, 32], strides = [1, 1]} : vector<2x64xf32> to vector<2x32xf32>
    %338 = arith.mulf %334, %337 : vector<2x32xf32>
    %339 = arith.mulf %333, %335 : vector<2x32xf32>
    %340 = arith.addf %338, %339 : vector<2x32xf32>
    %341 = math.tanh %340 : vector<2x32xf32>
    %342 = arith.mulf %336, %341 : vector<2x32xf32>
    %343 = tpu.concatenate %342, %340 in 1 : vector<2x32xf32>, vector<2x32xf32> -> vector<2x64xf32>
    %c0_82 = arith.constant 0 : index
    %c192 = arith.constant 192 : index
    %344 = vector.load %arg2[%c0_82, %c192] : memref<2x256xf32, #tpu.memory_space<vmem>>, vector<2x32xf32>
    tpu.vector_store %arg2[%c0_82, %c192], %342 {strides = array<i32>} : memref<2x256xf32, #tpu.memory_space<vmem>>, vector<2x32xf32>,
    %cst_83 = arith.constant dense<0.000000e+00> : vector<2x8xf32>
    %345 = tpu.matmul %343, %6, %cst_83 {dimension_numbers = #tpu.dot_dimension_numbers<[1], [0], [0], [1], [0, 0, 1, 1], [], []>} : vector<2x64xf32>, vector<64x8xf32>, vector<2x8xf32> -> vector<2x8xf32>
    %346 = vector.broadcast %10 : vector<1x8xf32> to vector<2x8xf32>
    %347 = arith.addf %345, %346 : vector<2x8xf32>
    %cst_84 = arith.constant dense<0.000000e+00> : vector<8x32xf32>
    %348 = tpu.matmul %347, %9, %cst_84 {dimension_numbers = #tpu.dot_dimension_numbers<[0], [0], [1], [1], [0, 1, 1, 1], [], []>} : vector<2x8xf32>, vector<2x32xf32>, vector<8x32xf32> -> vector<8x32xf32>
    %349 = arith.addf %348, %42 : vector<8x32xf32>
    %350 = math.tanh %349 : vector<8x32xf32>
    %cst_85 = arith.constant dense<0.000000e+00> : vector<1x32xf32>
    %351 = tpu.matmul %12, %350, %cst_85 {dimension_numbers = #tpu.dot_dimension_numbers<[1], [0], [0], [1], [0, 0, 1, 1], [], []>} : vector<1x8xf32>, vector<8x32xf32>, vector<1x32xf32> -> vector<1x32xf32>
    %352 = math.exp %351 : vector<1x32xf32>
    %353 = vector.extract_strided_slice %41 {offsets = [7, 0], sizes = [1, 32], strides = [1, 1]} : vector<8x32xf32> to vector<1x32xf32>
    %354 = arith.mulf %352, %353 : vector<1x32xf32>
    %355 = vector.broadcast %354 : vector<1x32xf32> to vector<2x32xf32>
    %356 = arith.mulf %9, %355 : vector<2x32xf32>
    %cst_86 = arith.constant dense<0.000000e+00> : vector<2x16xf32>
    %357 = tpu.matmul %356, %8, %cst_86 {dimension_numbers = #tpu.dot_dimension_numbers<[1], [0], [0], [1], [0, 0, 1, 1], [], []>} : vector<2x32xf32>, vector<32x16xf32>, vector<2x16xf32> -> vector<2x16xf32>
    %358 = vector.broadcast %352 : vector<1x32xf32> to vector<2x32xf32>
    %359 = arith.mulf %9, %358 : vector<2x32xf32>
    %cst_87 = arith.constant dense<0.000000e+00> : vector<2xf32>
    %360 = vector.multi_reduction <add>, %359, %cst_87 [1] : vector<2x32xf32> to vector<2xf32>
    %361 = vector.shape_cast %360 : vector<2xf32> to vector<2x1xf32>
    %362 = tpu.reciprocal %361 {approx = true} : vector<2x1xf32> -> vector<2x1xf32>
    %363 = vector.broadcast %362 : vector<2x1xf32> to vector<2x16xf32>
    %364 = arith.mulf %357, %363 : vector<2x16xf32>
    %365 = vector.extract_strided_slice %343 {offsets = [0, 0], sizes = [2, 32], strides = [1, 1]} : vector<2x64xf32> to vector<2x32xf32>
    %366 = tpu.concatenate %364, %365 in 1 : vector<2x16xf32>, vector<2x32xf32> -> vector<2x48xf32>
    %cst_88 = arith.constant dense<0.000000e+00> : vector<2x128xf32>
    %367 = tpu.matmul %366, %7, %cst_88 {dimension_numbers = #tpu.dot_dimension_numbers<[1], [0], [0], [1], [0, 0, 1, 1], [], []>} : vector<2x48xf32>, vector<48x128xf32>, vector<2x128xf32> -> vector<2x128xf32>
    %368 = vector.broadcast %13 : vector<1x128xf32> to vector<2x128xf32>
    %369 = arith.addf %367, %368 : vector<2x128xf32>
    %370 = arith.negf %369 : vector<2x128xf32>
    %371 = math.exp %370 : vector<2x128xf32>
    %cst_89 = arith.constant 1.000000e+00 : f32
    %372 = vector.broadcast %cst_89 : f32 to vector<2x128xf32>
    %373 = arith.addf %372, %371 : vector<2x128xf32>
    %374 = arith.divf %372, %373 : vector<2x128xf32>
    %375 = math.tanh %369 : vector<2x128xf32>
    %376 = vector.extract_strided_slice %374 {offsets = [0, 0], sizes = [2, 32], strides = [1, 1]} : vector<2x128xf32> to vector<2x32xf32>
    %377 = vector.extract_strided_slice %374 {offsets = [0, 32], sizes = [2, 32], strides = [1, 1]} : vector<2x128xf32> to vector<2x32xf32>
    %378 = vector.extract_strided_slice %375 {offsets = [0, 64], sizes = [2, 32], strides = [1, 1]} : vector<2x128xf32> to vector<2x32xf32>
    %379 = vector.extract_strided_slice %374 {offsets = [0, 96], sizes = [2, 32], strides = [1, 1]} : vector<2x128xf32> to vector<2x32xf32>
    %380 = vector.extract_strided_slice %343 {offsets = [0, 32], sizes = [2, 32], strides = [1, 1]} : vector<2x64xf32> to vector<2x32xf32>
    %381 = arith.mulf %377, %380 : vector<2x32xf32>
    %382 = arith.mulf %376, %378 : vector<2x32xf32>
    %383 = arith.addf %381, %382 : vector<2x32xf32>
    %384 = math.tanh %383 : vector<2x32xf32>
    %385 = arith.mulf %379, %384 : vector<2x32xf32>
    %c0_90 = arith.constant 0 : index
    %c224_91 = arith.constant 224 : index
    %386 = vector.load %arg2[%c0_90, %c224_91] : memref<2x256xf32, #tpu.memory_space<vmem>>, vector<2x32xf32>
    tpu.vector_store %arg2[%c0_90, %c224_91], %385 {strides = array<i32>} : memref<2x256xf32, #tpu.memory_space<vmem>>, vector<2x32xf32>,
    return
  }
}

</mosaic_0001>

<bundles_post_ra>
// kernel: attention_encoder.1
= control target key start
LH: loop header
LB: loop body
LE: loop exit
PB: predicated region body
PF: predicated region fallthrough
CT: control target
= control target key end

     0   :  { %7 = vsyncpa [#allocation3], 0  ;;  %s5433_s9 = smov [#allocation2]   ;;  %s6099_s0 = inlined_call_operand.vmem [shape: f32[32,32], index: 0, kind: input, shape index: {}]   ;;  %s6100_s1 = inlined_call_operand.hbm [shape: f32[256,128], index: 1, kind: input, shape index: {}]   ;;  %s6101_s2 = inlined_call_operand.vmem [shape: f32[2,256], index: 2, kind: output, shape index: {}]  }
   0x1   :  { %s15_s10 = sshll.u32 %s5433_s9, 4  ;;  %s5409_s13 = scalar_lea.hbm %s6100_s1, 4096  ;;  %s16_s10 = int_to_ptr.vmem [resolvable:$true] %s15_s10 }
   0x2   :  { %p5410_p0 = scmp.ne.s32.totalorder %s6100_s1, %s5409_s13  ;;  %p5413_p1 = scmp.lt.u32.totalorder %s5409_s13, %s6100_s1 }
   0x4   :  { %p5415_p2 = pnand %p5413_p1, %p5410_p0 }
   0x6   :  { %5418 = shalt.err (!%p5415_p2)
}
   0x7   :  { %s5419_s18 = scalar_lea.vmem %s16_s10, 4096  ;;  %p5424_p4 = scmp.lt.s32.totalorder %s16_s10, %s16_s10 }
   0x8   :  { %p5420_p3 = scmp.ne.s32.totalorder %s16_s10, %s5419_s18  ;;  %p5425_p5 = scmp.lt.s32.totalorder %s5419_s18, %s5419_s18 }
   0xa   :  { %p5426_p6 = por %p5425_p5, %p5424_p4 }
   0xc   :  { %p5427_p7 = pnand %p5426_p6, %p5420_p3 }
   0xe   :  { %5430 = shalt.err (!%p5427_p7)
}
   0xf   :  { %s5434_s19 = smov 128   ;;  %s5435_s20 = smov 8  }
  0x10   :  { %21 = dma.hbm_to_vmem [thread:$0]  %s6100_s1, 4096, %s16_s10, [#allocation3], %s5434_s19, %s5434_s19, %s5435_s20  }
  0x11   :  { %5431 = dma.done.wait [#allocation3], 4096  }
  0x12   :  { %5432 = vsyncadd [#allocation3], 4294963200  ;;  %v5436_v0 = vmov 0.0|0.0   ;;  %vm5437_vm0 = vmmov 0   ;;  %v5438_v1 = vmov 0.0   ;;  %v5439_v2 = vmov 0  }
  0x13   :  { %5033 = vmatprep.subr.bf16.mxu0 %v5436_v0  ;;  %4561 = vmatprep.mubr.msk.f32.mxu0 %vm5437_vm0, %v5438_v1  ;;  %v57_v3 = vld [vmem:[%s6099_s0] sm:$0xff]  ;;  %v58_v4 = vld [vmem:[%s6099_s0 + $0x8] sm:$0xff]  ;;  %v59_v5 = vld [vmem:[%s6099_s0 + $0x10] sm:$0xff]  ;;  %vm66_vm1 = vcmask 261120   ;;  %vm140_vm2 = vcmask 64512   ;;  %v363_v27 = vlaneseq  ;;  %vm708_vm8 = vcmask 1041408  }
  0x14   :  { %5275 = vset.pattern.permute.xlu0 %v5439_v2  ;;  %4564 = vmatprep.subr.mxu1 %v5438_v1  ;;  %v5034_v6 = vpack.c.bf16 %v58_v4, %v57_v3  ;;  %v60_v7 = vld [vmem:[%s6099_s0 + $0x18] sm:$0xff]  ;;  %v25_v10 = vld [vmem:[#allocation2] sm:$0xff]  ;;  %v54_v15 = vld [vmem:[#allocation2 + $0xe8] sm:$0x1]  ;;  %vm704_vm9 = vcmask 15360   ;;  %vm942_vm10 = vcmask 254976  }
  0x15   :  { %4566 = vmatprep.mubr.msk.f32.mxu1 %vm5437_vm0, %v5438_v1  ;;  %5276 = vset.pattern.permute.xlu1 %v5439_v2  ;;  %v28_v8 = vld [vmem:[#allocation2 + $0x18] sm:$0xff]  ;;  %v5037_v9 = vpack.c.bf16 %v60_v7, %v59_v5  ;;  %v27_v16 = vld [vmem:[#allocation2 + $0x10] sm:$0xff]  ;;  %v5507_v28 = vshrl.u32 %v363_v27, 7  ;;  %v30_v40 = vld [vmem:[#allocation2 + $0x28] sm:$0xff]  ;;  %vm948_vm11 = vcmask 130048   ;;  %vm954_vm12 = vcmask 392192  }
  0x16   :  { %63 = vperm.xlu0 %5275, %v28_v8   ;;  %5035 = vmatpush3.bf16.msra.mxu0 %v5034_v6  ;;  %v31_v34 = vld [vmem:[#allocation2 + $0x30] sm:$0xff]  ;;  %v32_v48 = vld [vmem:[#allocation2 + $0x38] sm:$0xff]  ;;  %v33_v54 = vld [vmem:[#allocation2 + $0x40] sm:$0xff]  ;;  %s5440_s0 = smov 64   ;;  %s5441_s30 = smov 32   ;;  %vm598_vm13 = vcmask 523264  }
  0x17   :  { %5036 = vmatprep.subr.bf16.mxu0 %v5436_v0  ;;  %v5510_v29 = vsub.s32 0, %v5507_v28  ;;  %v34_v59 = vld [vmem:[#allocation2 + $0x48] sm:$0xff]  ;;  %v35_v60 = vld [vmem:[#allocation2 + $0x50] sm:$0xff]  ;;  %v36_v61 = vld [vmem:[#allocation2 + $0x58] sm:$0xff]  ;;  %s5442_s3 = smov 16   ;;  %s5444_s4 = smov 96  }
  0x18   :  { %v5517_v62 = vpack.c.bf16 %v35_v60, %v34_v59  ;;  %v37_v63 = vld [vmem:[#allocation2 + $0x60] sm:$0xff]  ;;  %v38_v3 = vld [vmem:[#allocation2 + $0x68] sm:$0xff]  ;;  %v39_v4 = vld [vmem:[#allocation2 + $0x70] sm:$0xff]  ;;  %vm1527_vm14 = vcmask 517376   ;;  %vm1987_vm15 = vcmask 779776  }
  0x19   :  { %v5520_v2 = vpack.c.bf16 %v37_v63, %v36_v61  ;;  %v5524_v5 = vpack.c.bf16 %v39_v4, %v38_v3  ;;  %v40_v6 = vld [vmem:[#allocation2 + $0x78] sm:$0xff]  ;;  %v41_v7 = vld [vmem:[#allocation2 + $0x80] sm:$0xff]  ;;  %vm5041_vm7 = vmpackc.low %vm66_vm1, %vm66_vm1 }
  0x1a   :  { %5038 = vmatpush3.bf16.msra.mxu0 %v5037_v9  ;;  %v5528_v8 = vpack.c.bf16 %v41_v7, %v40_v6  ;;  %v5569_v63 = vld [vmem:[#allocation2 + $0xf0] sm:$0x1]  ;;  %v48_v4 = vld [vmem:[#allocation2 + $0xb8] sm:$0xff]  ;;  %v49_v6 = vld [vmem:[#allocation2 + $0xc0] sm:$0xff] }
  0x1b   :  { %5047 = vmatprep.subr.bf16.mxu0 %v5436_v0  ;;  %v5576_v7 = vpack.c.bf16 %v49_v6, %v48_v4 }
  0x1d   :  { %4562 = vmatmul.mubr.msk.f32.vlgmr.msra.gmra.mrb[0].mxu0 %vm66_vm1, %v25_v10 }
  0x1e   :  { %4609 = vmatprep.mubr.msk.f32.mxu0 %vm5437_vm0, %v5438_v1  ;;  %5049 = vmatpush3.bf16.msra.mxu0 %v5517_v62 }
  0x1f   :  { %5050 = vmatprep.subr.bf16.mxu0 %v5436_v0 }
  0x22   :  { %5052 = vmatpush3.bf16.msra.mxu0 %v5520_v2 }
  0x23   :  { %5053 = vmatprep.subr.bf16.mxu0 %v5436_v0 }
  0x26   :  { %5055 = vmatpush3.bf16.msra.mxu0 %v5524_v5 }
  0x27   :  { %5056 = vmatprep.subr.bf16.mxu0 %v5436_v0 }
  0x2a   :  { %5058 = vmatpush3.bf16.msra.mxu0 %v5528_v8 }
  0x2b   :  { %5059 = vmatprep.subr.bf16.mxu0 %v5436_v0 }
  0x2d   :  { %4610 = vmatmul.mubr.f32.vlgmr.msra.gmra.mrb[2].mxu0 %v5438_v1 }
  0x2e   :  { %4630 = vmatprep.mubr.msk.f32.mxu0 %vm5437_vm0, %v5438_v1  ;;  %5061 = vmatpush3.bf16.msra.mxu0 %v5576_v7 }
  0x2f   :  { %5062 = vmatprep.subr.bf16.mxu0 %v5436_v0 }
  0x95   :  { %v64_v11 = vpop.permute.xlu0 %63 }
  0xf0   :  { %v136_v12 = vpop.f32.mrb[0].mxu0 }
  0xf1   :  { %v5495_v13 = vadd.f32 %v136_v12, %v64_v11  ;;  %v4563_v14 = vpop.f32.mrb[1].mxu0 }
  0xf3   :  { %214 = vxpose.xlu0.b32.start.end [1/1] (short) (narrow) %v5495_v13, 32  ;;  %4565 = vmatpush3.msra.mxu1 %v5495_v13 }
  0xf4   :  { %4567 = vmatmul.mubr.msk.f32.vlgmr.msra.gmra.mrb[0].mxu1 %vm140_vm2, %v54_v15  ;;  %4569 = vmatprep.subr.mxu1 %v27_v16 }
  0xf5   :  { %4570 = vmatpush3.msra.mxu1 %v27_v16 }
  0xf6   :  { %5039 = vmatprep.subr.bf16.mxu1 %v5436_v0 }
 0x173   :  { %v230_v17 = vpop.trf.xlu0 }
 0x174   :  { %4571 = vmatprep.mubr.msk.f32.mxu1 %vm140_vm2, %v230_v17 }
 0x177   :  { %v231_v18 = vpop.trf.xlu0 }
 0x178   :  { %4572 = vmatmul.mubr.msk.f32.vlgmr.msra.gmra.mrb[2].mxu1 %vm140_vm2, %v231_v18 }
 0x17b   :  { %v232_v19 = vpop.trf.xlu0 }
 0x17c   :  { %4574 = vmatprep.mubr.msk.f32.mxu1 %vm140_vm2, %v232_v19 }
 0x17f   :  { %v233_v20 = vpop.trf.xlu0 }
 0x180   :  { %4575 = vmatmul.mubr.msk.f32.gmra.mrb[4].mxu1 %vm140_vm2, %v233_v20 }
 0x181   :  { %4585 = vmatprep.mubr.msk.f32.mxu1 %vm5437_vm0, %v5438_v1 }
 0x1c7   :  { %v210_v21 = vpop.f32.mrb[0].mxu1 }
 0x1c8   :  { %v4568_v22 = vpop.f32.mrb[1].mxu1  ;;  %v366_v30 = vrot.slane %v210_v21, %v5510_v29 }
 0x24b   :  { %v4573_v23 = vpop.f32.mrb[2].mxu1 }
 0x24c   :  { %350 = vperm.xlu1 %5276, %v4573_v23   ;;  %v324_v24 = vpop.f32.mrb[3].mxu1 }
 0x250   :  { %345 = vperm.xlu1 %5276, %v324_v24  }
 0x253   :  { %v4576_v25 = vpop.f32.mrb[4].mxu1 }
 0x254   :  { %v334_v26 = vpop.f32.mrb[5].mxu1 }
 0x255   :  { %355 = vperm.xlu1 %5276, %v334_v26  }
 0x259   :  { %360 = vperm.xlu1 %5276, %v4576_v25  }
 0x2cb   :  { %v351_v31 = vpop.permute.xlu1 %350 }
 0x2cc   :  { %v368_v32 = vadd.f32 %v366_v30, %v351_v31 }
 0x2ce   :  { %vm372_vm3 = vcmp.gt.f32.partialorder %v368_v32, 0.0  ;;  %v376_v33 = vmul.f32 0.2, %v368_v32 }
 0x2cf   :  { %v346_v35 = vpop.permute.xlu1 %345 }
 0x2d0   :  { %v367_v36 = vadd.f32 %v366_v30, %v346_v35  ;;  %v380_v37 = vsel %vm372_vm3, %v368_v32, %v376_v33  ;;  %v29_v32 = vld [vmem:[#allocation2 + $0x20] sm:$0xff] }
 0x2d1   :  { %v384_v38 = vadd.f32 %v380_v37, %v31_v34  ;;  %v5540_v33 = vld [vmem:[#allocation2 + $0xe0] ss:$0 sm:$0xff]  ;;  %v668_v34 = vpop.f32.mrb[2].mxu0 }
 0x2d2   :  { %vm371_vm4 = vcmp.gt.f32.partialorder %v367_v36, 0.0  ;;  %v375_v39 = vmul.f32 0.2, %v367_v36  ;;  %v669_v35 = vadd.f32 %v5540_v33, %v668_v34 }
 0x2d3   :  { %v390_v41 = vsel %vm66_vm1, %v384_v38, -inf }
 0x2d4   :  { %391 = vmax.xlane.f32.xlu0 %v390_v41  ;;  %v356_v42 = vpop.permute.xlu1 %355  ;;  %v379_v43 = vsel %vm371_vm4, %v367_v36, %v375_v39  ;;  %v4611_v36 = vpop.f32.mrb[3].mxu0 }
 0x2d5   :  { %v369_v44 = vadd.f32 %v366_v30, %v356_v42  ;;  %v383_v45 = vadd.f32 %v379_v43, %v30_v40 }
 0x2d7   :  { %vm373_vm5 = vcmp.gt.f32.partialorder %v369_v44, 0.0  ;;  %v377_v46 = vmul.f32 0.2, %v369_v44  ;;  %v387_v47 = vsel %vm66_vm1, %v383_v45, -inf }
 0x2d8   :  { %388 = vmax.xlane.f32.xlu1 %v387_v47  ;;  %v361_v49 = vpop.permute.xlu1 %360 }
 0x2d9   :  { %v370_v50 = vadd.f32 %v366_v30, %v361_v49  ;;  %v381_v51 = vsel %vm373_vm5, %v369_v44, %v377_v46 }
 0x2da   :  { %v385_v52 = vadd.f32 %v381_v51, %v32_v48 }
 0x2db   :  { %vm374_vm6 = vcmp.gt.f32.partialorder %v370_v50, 0.0  ;;  %v378_v53 = vmul.f32 0.2, %v370_v50 }
 0x2dc   :  { %v393_v55 = vsel %vm66_vm1, %v385_v52, -inf }
 0x2dd   :  { %394 = vmax.xlane.f32.xlu1 %v393_v55  ;;  %v382_v56 = vsel %vm374_vm6, %v370_v50, %v378_v53  ;;  %v26_v55 = vld [vmem:[#allocation2 + $0x8] sm:$0xff] }
 0x2de   :  { %v386_v57 = vadd.f32 %v382_v56, %v33_v54  ;;  %v5553_v56 = vld [vmem:[#allocation2 + $0xd8] sm:$0x3] }
 0x2e0   :  { %v396_v58 = vsel %vm66_vm1, %v386_v57, -inf }
 0x2e1   :  { %397 = vmax.xlane.f32.xlu1 %v396_v58 }
 0x301   :  { %672 = vxpose.xlu0.b32.start.end [1/1] (short) (narrow) %v669_v35, 8 }
 0x361   :  { %v392_v9 = vpop.xlane.xlu0 %391 }
 0x362   :  { %v400_v10 = vsub.f32 %v384_v38, %v392_v9  ;;  %v50_v9 = vld [vmem:[#allocation2 + $0xc8] sm:$0xff] }
 0x364   :  { %v405_v11 = vmul.f32 1.442695, %v400_v10  ;;  %v51_v10 = vld [vmem:[#allocation2 + $0xd0] sm:$0xff] }
 0x365   :  { %v389_v12 = vpop.xlane.xlu1 %388 }
 0x366   :  { %5277 = vpow2.f32 %v405_v11  ;;  %v399_v14 = vsub.f32 %v383_v45, %v389_v12  ;;  %v5580_v11 = vpack.c.bf16 %v51_v10, %v50_v9 }
 0x368   :  { %v403_v15 = vmul.f32 1.442695, %v399_v14  ;;  %5064 = vmatpush3.bf16.msra.mxu0 %v5580_v11 }
 0x369   :  { %5074 = vmatprep.subr.bf16.mxu0 %v5436_v0 }
 0x36a   :  { %5279 = vpow2.f32 %v403_v15  ;;  %v395_v16 = vpop.xlane.xlu1 %394 }
 0x36b   :  { %v401_v17 = vsub.f32 %v385_v52, %v395_v16 }
 0x36d   :  { %v407_v18 = vmul.f32 1.442695, %v401_v17 }
 0x36e   :  { %v398_v19 = vpop.xlane.xlu1 %397 }
 0x36f   :  { %5281 = vpow2.f32 %v407_v18  ;;  %v402_v20 = vsub.f32 %v386_v57, %v398_v19 }
 0x370   :  { %v5278_v21 = vpop.eup %5277 }
 0x371   :  { %v409_v22 = vmul.f32 1.442695, %v402_v20  ;;  %v414_v23 = vsel %vm66_vm1, %v5278_v21, 0.0 }
 0x372   :  { %415 = vadd.xlane.f32.xlu1 %v414_v23  ;;  %v42_v23 = vld [vmem:[#allocation2 + $0x88] sm:$0xff] }
 0x373   :  { %5283 = vpow2.f32 %v409_v22 }
 0x374   :  { %v5280_v24 = vpop.eup %5279 }
 0x375   :  { %v411_v25 = vsel %vm66_vm1, %v5280_v24, 0.0 }
 0x376   :  { %412 = vadd.xlane.f32.xlu1 %v411_v25  ;;  %v44_v25 = vld [vmem:[#allocation2 + $0x98] sm:$0xff] }
 0x379   :  { %v5282_v26 = vpop.eup %5281 }
 0x37a   :  { %v417_v27 = vsel %vm66_vm1, %v5282_v26, 0.0 }
 0x37b   :  { %418 = vadd.xlane.f32.xlu1 %v417_v27  ;;  %v45_v27 = vld [vmem:[#allocation2 + $0xa0] sm:$0xff] }
 0x37d   :  { %v5284_v30 = vpop.eup %5283 }
 0x37e   :  { %v420_v31 = vsel %vm66_vm1, %v5284_v30, 0.0 }
 0x37f   :  { %421 = vadd.xlane.f32.xlu1 %v420_v31  ;;  %v46_v31 = vld [vmem:[#allocation2 + $0xa8] sm:$0xff] }
 0x390   :  { %433 = vperm.xlu1 %5276, %v29_v32   ;;  %v47_v32 = vld [vmem:[#allocation2 + $0xb0] sm:$0xff] }
 0x391   :  { %v5609_v34 = vpack.c.bf16 %v47_v32, %v46_v31 }
 0x3ff   :  { %v416_v37 = vpop.xlane.xlu1 %415 }
 0x400   :  { %5285 = vrcp.f32 %v416_v37 }
 0x403   :  { %v413_v38 = vpop.xlane.xlu1 %412 }
 0x404   :  { %5287 = vrcp.f32 %v413_v38 }
 0x408   :  { %v419_v39 = vpop.xlane.xlu1 %418 }
 0x409   :  { %5289 = vrcp.f32 %v419_v39 }
 0x40a   :  { %v5286_v40 = vpop.eup %5285 }
 0x40b   :  { %v428_v43 = vmul.f32 %v5286_v40, %v5278_v21 }
 0x40c   :  { %v422_v41 = vpop.xlane.xlu1 %421 }
 0x40d   :  { %5291 = vrcp.f32 %v422_v41  ;;  %v5620_v41 = vld [vmem:[#allocation2 + $0xf8] ss:$0 sm:$0xff] }
 0x40e   :  { %v5288_v42 = vpop.eup %5287 }
 0x40f   :  { %v427_v44 = vmul.f32 %v5288_v42, %v5280_v24  ;;  %v43_v24 = vld [vmem:[#allocation2 + $0x90] sm:$0xff] }
 0x410   :  { %v434_v51 = vpop.permute.xlu1 %433 }
 0x411   :  { %v5040_v45 = vpack.c.bf16 %v428_v43, %v427_v44 }
 0x413   :  { %5042 = vmatpush3.bf16.xpose.msk.msra.mxu1 %vm5041_vm7, %v5040_v45  ;;  %v5290_v46 = vpop.eup %5289 }
 0x414   :  { %5043 = vmatprep.subr.bf16.mxu1 %v5436_v0  ;;  %v429_v48 = vmul.f32 %v5290_v46, %v5282_v26  ;;  %v5600_v26 = vpack.c.bf16 %v43_v24, %v42_v23 }
 0x417   :  { %v5292_v47 = vpop.eup %5291 }
 0x418   :  { %v430_v49 = vmul.f32 %v5292_v47, %v5284_v30  ;;  %v5604_v30 = vpack.c.bf16 %v45_v27, %v44_v25 }
 0x41a   :  { %v5044_v50 = vpack.c.bf16 %v430_v49, %v429_v48 }
 0x41c   :  { %5046 = vmatpush3.bf16.xpose.msk.msra.mxu1 %vm5041_vm7, %v5044_v50 }
 0x41d   :  { %4588 = vmatprep.subr.mxu1 %v5438_v1 }
 0x423   :  { %4586 = vmatmul.mubr.msk.f32.vlgmr.msra.gmra.mrb[6].mxu1 %vm66_vm1, %v5495_v13  ;;  %v688_v13 = vpop.trf.xlu0 }
 0x424   :  { %4590 = vmatprep.mubr.msk.f32.mxu1 %vm5437_vm0, %v5438_v1 }
 0x4f6   :  { %v517_v52 = vpop.f32.mrb[6].mxu1 }
 0x4f7   :  { %v5551_v53 = vadd.f32 %v517_v52, %v434_v51  ;;  %v4587_v54 = vpop.f32.mrb[7].mxu1 }
 0x4f9   :  { %4589 = vmatpush3.msra.mxu1 %v5551_v53 }
 0x4fa   :  { %4591 = vmatmul.mubr.msk.f32.vlgmr.msra.gmra.mrb[8].mxu1 %vm140_vm2, %v26_v55  ;;  %4612 = vmatprep.subr.mxu1 %v5438_v1 }
 0x4fb   :  { %4613 = vmatpush3.msk.msra.mxu1 %vm708_vm8, %v5553_v56  ;;  %4614 = vmatprep.mubr.msk.f32.mxu1 %vm5437_vm0, %v5438_v1 }
 0x4fc   :  { %4617 = vmatprep.subr.mxu1 %v5438_v1 }
 0x4fe   :  { %4615 = vmatmul.mubr.msk.f32.vlgmr.msra.gmra.mrb[10].mxu1 %vm704_vm9, %v688_v13 }
 0x4ff   :  { %4619 = vmatprep.mubr.msk.f32.mxu1 %vm5437_vm0, %v5438_v1 }
 0x5cd   :  { %v5566_v57 = vpop.f32.mrb[8].mxu1 }
 0x5ce   :  { %v4592_v58 = vpop.f32.mrb[9].mxu1 }
 0x5d1   :  { %v778_v59 = vpop.f32.mrb[10].mxu1 }
 0x5d2   :  { %v779_v60 = vadd.f32 %v778_v59, %v5566_v57  ;;  %v4616_v61 = vpop.f32.mrb[11].mxu1 }
 0x5d4   :  { %5293 = vtanh.f32 %v779_v60 }
 0x5de   :  { %v5294_v3 = vpop.eup %5293 }
 0x5df   :  { %4618 = vmatpush3.msra.mxu1 %v5294_v3 }
 0x5e0   :  { %4620 = vmatmul.mubr.msk.f32.vlgmr.msra.gmra.mrb[12].mxu1 %vm140_vm2, %v5569_v63  ;;  %5065 = vmatprep.subr.bf16.mxu1 %v5436_v0 }
 0x5e1   :  { %4645 = vmatprep.mubr.msk.f32.mxu1 %vm5437_vm0, %v5438_v1  ;;  %5067 = vmatpush3.bf16.msra.mxu1 %v5600_v26 }
 0x5e2   :  { %5068 = vmatprep.subr.bf16.mxu1 %v5436_v0 }
 0x5e5   :  { %5070 = vmatpush3.bf16.msra.mxu1 %v5604_v30 }
 0x5e6   :  { %5071 = vmatprep.subr.bf16.mxu1 %v5436_v0 }
 0x5e9   :  { %5073 = vmatpush3.bf16.msra.mxu1 %v5609_v34 }
 0x5ea   :  { %4667 = vmatprep.subr.mxu1 %v5438_v1 }
 0x6b3   :  { %v852_v12 = vpop.f32.mrb[12].mxu1 }
 0x6b4   :  { %v856_v14 = vmul.f32 1.442695, %v852_v12  ;;  %v4621_v15 = vpop.f32.mrb[13].mxu1 }
 0x6b6   :  { %5295 = vpow2.f32 %v856_v14 }
 0x6c0   :  { %v5296_v16 = vpop.eup %5295 }
 0x6c1   :  { %v858_v17 = vmul.f32 %v5296_v16, %v5551_v53  ;;  %v940_v18 = vrot.slane %v5296_v16, %v5510_v29 }
 0x6c3   :  { %v941_v19 = vmul.f32 %v940_v18, %v5553_v56  ;;  %v862_v20 = vrot.slane %v858_v17, %v5510_v29 }
 0x6c5   :  { %v943_v21 = vsel %vm942_vm10, %v941_v19, 0.0  ;;  %v863_v22 = vmul.f32 %v862_v20, %v5553_v56  ;;  %v1320_v19 = vrot.slane %v5551_v53, 1 }
 0x6c6   :  { %944 = vadd.xlane.f32.xlu1 %v943_v21 }
 0x6c7   :  { %4631 = vmatmul.mubr.msk.f32.vlgmr.msra.gmra.mrb[4].mxu0 %vm66_vm1, %v863_v22 }
 0x6c8   :  { %5076 = vmatpush3.bf16.msra.mxu0 %v5517_v62  ;;  %4664 = vmatprep.mubr.msk.f32.mxu0 %vm5437_vm0, %v5438_v1 }
 0x6c9   :  { %5077 = vmatprep.subr.bf16.mxu0 %v5436_v0 }
 0x6cc   :  { %5079 = vmatpush3.bf16.msra.mxu0 %v5520_v2 }
 0x6cd   :  { %5080 = vmatprep.subr.bf16.mxu0 %v5436_v0 }
 0x6d0   :  { %5082 = vmatpush3.bf16.msra.mxu0 %v5524_v5 }
 0x6d1   :  { %5083 = vmatprep.subr.bf16.mxu0 %v5436_v0 }
 0x6d4   :  { %5085 = vmatpush3.bf16.msra.mxu0 %v5528_v8 }
 0x6d5   :  { %5092 = vmatprep.subr.bf16.mxu0 %v5436_v0 }
 0x753   :  { %v945_v35 = vpop.xlane.xlu1 %944 }
 0x754   :  { %5297 = vrcp.f32 %v945_v35 }
 0x75e   :  { %v5298_v36 = vpop.eup %5297 }
 0x79a   :  { %v933_v37 = vpop.f32.mrb[4].mxu0 }
 0x79b   :  { %v947_v38 = vmul.f32 %v5298_v36, %v933_v37  ;;  %v4632_v39 = vpop.f32.mrb[5].mxu0 }
 0x79d   :  { %v949_v40 = vsel %vm948_vm11, %v947_v38, 0.0 }
 0x79e   :  { %4646 = vmatmul.mubr.msk.f32.vlgmr.msra.gmra.mrb[14].mxu1 %vm954_vm12, %v949_v40 }
 0x79f   :  { %4668 = vmatpush3.msk.msra.mxu1 %vm708_vm8, %v5553_v56  ;;  %4669 = vmatprep.mubr.msk.f32.mxu1 %vm5437_vm0, %v5438_v1 }
 0x7a0   :  { %4672 = vmatprep.subr.mxu1 %v5438_v1 }
 0x871   :  { %v1024_v42 = vpop.f32.mrb[14].mxu1 }
 0x872   :  { %v1025_v43 = vadd.f32 %v5620_v41, %v1024_v42  ;;  %v4647_v44 = vpop.f32.mrb[15].mxu1 }
 0x874   :  { %5299 = vtanh.f32 %v1025_v43  ;;  %v4284_v46 = vmul.f32 -1.442695, %v1025_v43 }
 0x876   :  { %5301 = vpow2.f32 %v4284_v46 }
 0x87e   :  { %v5300_v45 = vpop.eup %5299 }
 0x87f   :  { %1037 = vrot.lane.b32.xlu1 %v5300_v45, %s5440_s0 }
 0x880   :  { %v5302_v47 = vpop.eup %5301 }
 0x881   :  { %v1031_v48 = vadd.f32 1.0, %v5302_v47 }
 0x883   :  { %5303 = vrcp.f32 %v1031_v48 }
 0x88d   :  { %v5304_v49 = vpop.eup %5303 }
 0x88e   :  { %v1035_v52 = vmul.f32 0.0, %v5304_v49 }
 0x8f1   :  { %v1038_v50 = vpop.permute.xlu1 %1037 }
 0x8f2   :  { %v1040_v51 = vmul.f32 %v5304_v49, %v1038_v50 }
 0x8f4   :  { %1042 = vrot.lane.b32.xlu0 %v1040_v51, %s5441_s30 }
 0x966   :  { %v1043_v54 = vpop.permute.xlu0 %1042 }
 0x967   :  { %v1045_v55 = vadd.f32 %v1043_v54, %v1035_v52 }
 0x969   :  { %5305 = vtanh.f32 %v1045_v55 }
 0x973   :  { %v5306_v13 = vpop.eup %5305 }
 0x974   :  { %1048 = vrot.lane.b32.xlu1 %v5306_v13, %s5440_s0 }
 0x9e6   :  { %v1049_v58 = vpop.permute.xlu1 %1048 }
 0x9e7   :  { %v5626_v59 = vmul.f32 %v5304_v49, %v1049_v58 }
 0x9e9   :  { %1053 = vrot.lane.b32.xlu1 %v5626_v59, %s5441_s30 }
 0xa5b   :  { %v1054_v60 = vpop.permute.xlu1 %1053 }
 0xa5c   :  { %v5631_v61 = vsel %vm66_vm1, %v1054_v60, %v1045_v55 }
 0xa5d   :  { %4665 = vmatmul.mubr.msk.f32.vlgmr.msra.gmra.mrb[6].mxu0 %vm598_vm13, %v5631_v61 }
 0xa5e   :  { %5094 = vmatpush3.bf16.msra.mxu0 %v5600_v26  ;;  %4700 = vmatprep.mubr.msk.f32.mxu0 %vm5437_vm0, %v5438_v1 }
 0xa5f   :  { %5095 = vmatprep.subr.bf16.mxu0 %v5436_v0 }
 0xa62   :  { %5097 = vmatpush3.bf16.msra.mxu0 %v5604_v30 }
 0xa63   :  { %5098 = vmatprep.subr.bf16.mxu0 %v5436_v0 }
 0xa66   :  { %5100 = vmatpush3.bf16.msra.mxu0 %v5609_v34 }
 0xa67   :  { %4722 = vmatprep.subr.mxu0 %v5438_v1 }
 0xb30   :  { %v1137_v3 = vpop.f32.mrb[6].mxu0 }
 0xb31   :  { %v1138_v4 = vadd.f32 %v5540_v33, %v1137_v3  ;;  %v4666_v6 = vpop.f32.mrb[7].mxu0 }
 0xb33   :  { %1141 = vxpose.xlu1.b32.start.end [1/1] (short) (narrow) %v1138_v4, 8 }
 0xb51   :  { %1411 = vrot.lane.b32.xlu1 %v5631_v61, %s5442_s3 }
 0xbb3   :  { %v1157_v9 = vpop.trf.xlu1 }
 0xbb4   :  { %4670 = vmatmul.mubr.msk.f32.vlgmr.msra.gmra.mrb[16].mxu1 %vm704_vm9, %v1157_v9 }
 0xbb5   :  { %4674 = vmatprep.mubr.msk.f32.mxu1 %vm5437_vm0, %v5438_v1 }
 0xbc3   :  { %v1412_v38 = vpop.permute.xlu1 %1411 }
 0xc87   :  { %v1242_v10 = vpop.f32.mrb[16].mxu1 }
 0xc88   :  { %v1243_v12 = vadd.f32 %v1242_v10, %v5566_v57  ;;  %v4671_v14 = vpop.f32.mrb[17].mxu1 }
 0xc8a   :  { %5307 = vtanh.f32 %v1243_v12 }
 0xc94   :  { %v5308_v15 = vpop.eup %5307 }
 0xc95   :  { %4673 = vmatpush3.msra.mxu1 %v5308_v15 }
 0xc96   :  { %4675 = vmatmul.mubr.msk.f32.vlgmr.msra.gmra.mrb[18].mxu1 %vm140_vm2, %v5569_v63  ;;  %5086 = vmatprep.subr.bf16.mxu1 %v5436_v0 }
 0xc97   :  { %5088 = vmatpush3.bf16.msra.mxu1 %v5576_v7  ;;  %4685 = vmatprep.mubr.msk.f32.mxu1 %vm5437_vm0, %v5438_v1 }
 0xc98   :  { %5089 = vmatprep.subr.bf16.mxu1 %v5436_v0 }
 0xc9b   :  { %5091 = vmatpush3.bf16.msra.mxu1 %v5580_v11 }
 0xc9c   :  { %5101 = vmatprep.subr.bf16.mxu1 %v5436_v0 }
 0xd69   :  { %v1313_v16 = vpop.f32.mrb[18].mxu1 }
 0xd6a   :  { %v1317_v17 = vmul.f32 1.442695, %v1313_v16  ;;  %v4676_v18 = vpop.f32.mrb[19].mxu1 }
 0xd6c   :  { %5309 = vpow2.f32 %v1317_v17 }
 0xd76   :  { %v5310_v20 = vpop.eup %5309 }
 0xd77   :  { %v1322_v21 = vmul.f32 %v5310_v20, %v1320_v19  ;;  %v1404_v22 = vrot.slane %v5310_v20, %v5510_v29  ;;  %v1780_v19 = vrot.slane %v5551_v53, 2 }
 0xd79   :  { %v1405_v23 = vmul.f32 %v1404_v22, %v5553_v56  ;;  %v1326_v24 = vrot.slane %v1322_v21, %v5510_v29 }
 0xd7b   :  { %v1406_v25 = vsel %vm942_vm10, %v1405_v23, 0.0  ;;  %v1327_v27 = vmul.f32 %v1326_v24, %v5553_v56 }
 0xd7c   :  { %1407 = vadd.xlane.f32.xlu0 %v1406_v25 }
 0xd7d   :  { %4686 = vmatmul.mubr.msk.f32.vlgmr.msra.gmra.mrb[20].mxu1 %vm66_vm1, %v1327_v27 }
 0xd7e   :  { %5103 = vmatpush3.bf16.msra.mxu1 %v5517_v62  ;;  %4719 = vmatprep.mubr.msk.f32.mxu1 %vm5437_vm0, %v5438_v1 }
 0xd7f   :  { %5104 = vmatprep.subr.bf16.mxu1 %v5436_v0 }
 0xd82   :  { %5106 = vmatpush3.bf16.msra.mxu1 %v5520_v2 }
 0xd83   :  { %5107 = vmatprep.subr.bf16.mxu1 %v5436_v0 }
 0xd86   :  { %5109 = vmatpush3.bf16.msra.mxu1 %v5524_v5 }
 0xd87   :  { %5110 = vmatprep.subr.bf16.mxu1 %v5436_v0 }
 0xd8a   :  { %5112 = vmatpush3.bf16.msra.mxu1 %v5528_v8 }
 0xd8b   :  { %5119 = vmatprep.subr.bf16.mxu1 %v5436_v0 }
 0xe09   :  { %v1408_v31 = vpop.xlane.xlu0 %1407 }
 0xe0a   :  { %5311 = vrcp.f32 %v1408_v31 }
 0xe14   :  { %v5312_v32 = vpop.eup %5311 }
 0xe50   :  { %v1397_v35 = vpop.f32.mrb[20].mxu1 }
 0xe51   :  { %v1410_v36 = vmul.f32 %v5312_v32, %v1397_v35  ;;  %v4687_v37 = vpop.f32.mrb[21].mxu1 }
 0xe53   :  { %v1414_v39 = vsel %vm948_vm11, %v1410_v36, %v1412_v38 }
 0xe54   :  { %4701 = vmatmul.mubr.msk.f32.vlgmr.msra.gmra.mrb[8].mxu0 %vm954_vm12, %v1414_v39 }
 0xe55   :  { %4723 = vmatpush3.msk.msra.mxu0 %vm708_vm8, %v5553_v56  ;;  %4724 = vmatprep.mubr.msk.f32.mxu0 %vm5437_vm0, %v5438_v1 }
 0xe56   :  { %4727 = vmatprep.subr.mxu0 %v5438_v1 }
 0xf27   :  { %v1484_v40 = vpop.f32.mrb[8].mxu0 }
 0xf28   :  { %v1485_v42 = vadd.f32 %v5620_v41, %v1484_v40  ;;  %v4702_v43 = vpop.f32.mrb[9].mxu0 }
 0xf2a   :  { %5313 = vtanh.f32 %v1485_v42  ;;  %v4291_v45 = vmul.f32 -1.442695, %v1485_v42 }
 0xf2c   :  { %5315 = vpow2.f32 %v4291_v45 }
 0xf34   :  { %v5314_v44 = vpop.eup %5313 }
 0xf35   :  { %1497 = vrot.lane.b32.xlu0 %v5314_v44, %s5440_s0 }
 0xf36   :  { %v5316_v46 = vpop.eup %5315 }
 0xf37   :  { %v1491_v47 = vadd.f32 1.0, %v5316_v46 }
 0xf39   :  { %5317 = vrcp.f32 %v1491_v47 }
 0xf43   :  { %v5318_v48 = vpop.eup %5317 }
 0xf44   :  { %v1495_v51 = vmul.f32 %v5318_v48, %v5631_v61 }
 0xfa7   :  { %v1498_v49 = vpop.permute.xlu0 %1497 }
 0xfa8   :  { %v1500_v50 = vmul.f32 %v5318_v48, %v1498_v49 }
 0xfaa   :  { %1502 = vrot.lane.b32.xlu1 %v1500_v50, %s5441_s30 }
0x101c   :  { %v1503_v52 = vpop.permute.xlu1 %1502 }
0x101d   :  { %v1505_v54 = vadd.f32 %v1503_v52, %v1495_v51 }
0x101f   :  { %5319 = vtanh.f32 %v1505_v54 }
0x1029   :  { %v5320_v55 = vpop.eup %5319 }
0x102a   :  { %1508 = vrot.lane.b32.xlu1 %v5320_v55, %s5440_s0 }
0x109c   :  { %v1509_v13 = vpop.permute.xlu1 %1508 }
0x109d   :  { %v5688_v58 = vmul.f32 %v5318_v48, %v1509_v13 }
0x109f   :  { %1513 = vrot.lane.b32.xlu0 %v5688_v58, %s5441_s30 }
0x1111   :  { %v1514_v60 = vpop.permute.xlu0 %1513 }
0x1112   :  { %v5693_v3 = vsel %vm66_vm1, %v1514_v60, %v1505_v54 }
0x1113   :  { %4720 = vmatmul.mubr.msk.f32.vlgmr.msra.gmra.mrb[22].mxu1 %vm598_vm13, %v5693_v3 }
0x1114   :  { %5121 = vmatpush3.bf16.msra.mxu1 %v5600_v26  ;;  %4755 = vmatprep.mubr.msk.f32.mxu1 %vm5437_vm0, %v5438_v1 }
0x1115   :  { %5122 = vmatprep.subr.bf16.mxu1 %v5436_v0 }
0x1118   :  { %5124 = vmatpush3.bf16.msra.mxu1 %v5604_v30 }
0x1119   :  { %5125 = vmatprep.subr.bf16.mxu1 %v5436_v0 }
0x111c   :  { %5127 = vmatpush3.bf16.msra.mxu1 %v5609_v34 }
0x111d   :  { %4777 = vmatprep.subr.mxu1 %v5438_v1 }
0x11e6   :  { %v1598_v61 = vpop.f32.mrb[22].mxu1 }
0x11e7   :  { %v1599_v4 = vadd.f32 %v5540_v33, %v1598_v61  ;;  %v4721_v6 = vpop.f32.mrb[23].mxu1 }
0x11e9   :  { %1602 = vxpose.xlu1.b32.start.end [1/1] (short) (narrow) %v1599_v4, 8 }
0x1269   :  { %v1618_v9 = vpop.trf.xlu1 }
0x126a   :  { %4725 = vmatmul.mubr.msk.f32.vlgmr.msra.gmra.mrb[10].mxu0 %vm704_vm9, %v1618_v9 }
0x126b   :  { %4729 = vmatprep.mubr.msk.f32.mxu0 %vm5437_vm0, %v5438_v1 }
0x133d   :  { %v1703_v10 = vpop.f32.mrb[10].mxu0 }
0x133e   :  { %v1704_v12 = vadd.f32 %v1703_v10, %v5566_v57  ;;  %v4726_v14 = vpop.f32.mrb[11].mxu0 }
0x1340   :  { %5321 = vtanh.f32 %v1704_v12 }
0x134a   :  { %v5322_v15 = vpop.eup %5321 }
0x134b   :  { %4728 = vmatpush3.msra.mxu0 %v5322_v15 }
0x134c   :  { %4730 = vmatmul.mubr.msk.f32.vlgmr.msra.gmra.mrb[12].mxu0 %vm140_vm2, %v5569_v63  ;;  %5113 = vmatprep.subr.bf16.mxu0 %v5436_v0 }
0x134d   :  { %5115 = vmatpush3.bf16.msra.mxu0 %v5576_v7  ;;  %4740 = vmatprep.mubr.msk.f32.mxu0 %vm5437_vm0, %v5438_v1 }
0x134e   :  { %5116 = vmatprep.subr.bf16.mxu0 %v5436_v0 }
0x1351   :  { %5118 = vmatpush3.bf16.msra.mxu0 %v5580_v11 }
0x1352   :  { %5128 = vmatprep.subr.bf16.mxu0 %v5436_v0 }
0x141f   :  { %v1774_v16 = vpop.f32.mrb[12].mxu0 }
0x1420   :  { %v1778_v17 = vmul.f32 1.442695, %v1774_v16  ;;  %v4731_v18 = vpop.f32.mrb[13].mxu0 }
0x1422   :  { %5323 = vpow2.f32 %v1778_v17 }
0x142c   :  { %v5324_v20 = vpop.eup %5323 }
0x142d   :  { %v1782_v21 = vmul.f32 %v5324_v20, %v1780_v19  ;;  %v1864_v22 = vrot.slane %v5324_v20, %v5510_v29  ;;  %v2240_v20 = vrot.slane %v5551_v53, 3 }
0x142f   :  { %v1865_v23 = vmul.f32 %v1864_v22, %v5553_v56  ;;  %v1786_v24 = vrot.slane %v1782_v21, %v5510_v29 }
0x1431   :  { %v1866_v25 = vsel %vm942_vm10, %v1865_v23, 0.0  ;;  %v1787_v27 = vmul.f32 %v1786_v24, %v5553_v56 }
0x1432   :  { %1867 = vadd.xlane.f32.xlu0 %v1866_v25 }
0x1433   :  { %4741 = vmatmul.mubr.msk.f32.vlgmr.msra.gmra.mrb[14].mxu0 %vm66_vm1, %v1787_v27 }
0x1434   :  { %5130 = vmatpush3.bf16.msra.mxu0 %v5517_v62  ;;  %4774 = vmatprep.mubr.msk.f32.mxu0 %vm5437_vm0, %v5438_v1 }
0x1435   :  { %5131 = vmatprep.subr.bf16.mxu0 %v5436_v0 }
0x1438   :  { %5133 = vmatpush3.bf16.msra.mxu0 %v5520_v2 }
0x1439   :  { %5134 = vmatprep.subr.bf16.mxu0 %v5436_v0 }
0x143c   :  { %5136 = vmatpush3.bf16.msra.mxu0 %v5524_v5 }
0x143d   :  { %5137 = vmatprep.subr.bf16.mxu0 %v5436_v0 }
0x1440   :  { %5139 = vmatpush3.bf16.msra.mxu0 %v5528_v8 }
0x1441   :  { %5146 = vmatprep.subr.bf16.mxu0 %v5436_v0 }
0x1448   :  { %1871 = vrot.lane.b32.xlu0 %v5693_v3, %s5442_s3 }
0x14bf   :  { %v1868_v31 = vpop.xlane.xlu0 %1867 }
0x14c0   :  { %5325 = vrcp.f32 %v1868_v31 }
0x14c3   :  { %v1872_v38 = vpop.permute.xlu0 %1871 }
0x14ca   :  { %v5326_v32 = vpop.eup %5325 }
0x1506   :  { %v1857_v35 = vpop.f32.mrb[14].mxu0 }
0x1507   :  { %v1870_v36 = vmul.f32 %v5326_v32, %v1857_v35  ;;  %v4742_v37 = vpop.f32.mrb[15].mxu0 }
0x1509   :  { %v1874_v39 = vsel %vm948_vm11, %v1870_v36, %v1872_v38 }
0x150a   :  { %4756 = vmatmul.mubr.msk.f32.vlgmr.msra.gmra.mrb[24].mxu1 %vm954_vm12, %v1874_v39 }
0x150b   :  { %4778 = vmatpush3.msk.msra.mxu1 %vm708_vm8, %v5553_v56  ;;  %4779 = vmatprep.mubr.msk.f32.mxu1 %vm5437_vm0, %v5438_v1 }
0x150c   :  { %4782 = vmatprep.subr.mxu1 %v5438_v1 }
0x15dd   :  { %v1944_v40 = vpop.f32.mrb[24].mxu1 }
0x15de   :  { %v1945_v42 = vadd.f32 %v5620_v41, %v1944_v40  ;;  %v4757_v43 = vpop.f32.mrb[25].mxu1 }
0x15e0   :  { %5327 = vtanh.f32 %v1945_v42  ;;  %v4298_v45 = vmul.f32 -1.442695, %v1945_v42 }
0x15e2   :  { %5329 = vpow2.f32 %v4298_v45 }
0x15ea   :  { %v5328_v44 = vpop.eup %5327 }
0x15eb   :  { %1957 = vrot.lane.b32.xlu1 %v5328_v44, %s5440_s0 }
0x15ec   :  { %v5330_v46 = vpop.eup %5329 }
0x15ed   :  { %v1951_v47 = vadd.f32 1.0, %v5330_v46 }
0x15ef   :  { %5331 = vrcp.f32 %v1951_v47 }
0x15f9   :  { %v5332_v48 = vpop.eup %5331 }
0x15fa   :  { %v1955_v51 = vmul.f32 %v5332_v48, %v5693_v3 }
0x165d   :  { %v1958_v49 = vpop.permute.xlu1 %1957 }
0x165e   :  { %v1960_v50 = vmul.f32 %v5332_v48, %v1958_v49 }
0x1660   :  { %1962 = vrot.lane.b32.xlu0 %v1960_v50, %s5441_s30 }
0x16d2   :  { %v1963_v52 = vpop.permute.xlu0 %1962 }
0x16d3   :  { %v1965_v54 = vadd.f32 %v1963_v52, %v1955_v51 }
0x16d5   :  { %5333 = vtanh.f32 %v1965_v54 }
0x16df   :  { %v5334_v55 = vpop.eup %5333 }
0x16e0   :  { %1968 = vrot.lane.b32.xlu0 %v5334_v55, %s5440_s0 }
0x1752   :  { %v1969_v13 = vpop.permute.xlu0 %1968 }
0x1753   :  { %v5750_v60 = vmul.f32 %v5332_v48, %v1969_v13 }
0x1755   :  { %1973 = vrot.lane.b32.xlu0 %v5750_v60, %s5441_s30 }
0x17c7   :  { %v1974_v61 = vpop.permute.xlu0 %1973 }
0x17c8   :  { %v5755_v4 = vsel %vm66_vm1, %v1974_v61, %v1965_v54 }
0x17c9   :  { %4775 = vmatmul.mubr.msk.f32.vlgmr.msra.gmra.mrb[16].mxu0 %vm598_vm13, %v5755_v4 }
0x17ca   :  { %5148 = vmatpush3.bf16.msra.mxu0 %v5600_v26  ;;  %4810 = vmatprep.mubr.msk.f32.mxu0 %vm5437_vm0, %v5438_v1 }
0x17cb   :  { %5149 = vmatprep.subr.bf16.mxu0 %v5436_v0 }
0x17ce   :  { %5151 = vmatpush3.bf16.msra.mxu0 %v5604_v30 }
0x17cf   :  { %5152 = vmatprep.subr.bf16.mxu0 %v5436_v0 }
0x17d2   :  { %5154 = vmatpush3.bf16.msra.mxu0 %v5609_v34 }
0x17d3   :  { %4832 = vmatprep.subr.mxu0 %v5438_v1 }
0x189c   :  { %v2058_v3 = vpop.f32.mrb[16].mxu0 }
0x189d   :  { %v2059_v6 = vadd.f32 %v5540_v33, %v2058_v3  ;;  %v4776_v9 = vpop.f32.mrb[17].mxu0 }
0x189f   :  { %2062 = vxpose.xlu0.b32.start.end [1/1] (short) (narrow) %v2059_v6, 8 }
0x18c8   :  { %2331 = vrot.lane.b32.xlu0 %v5755_v4, %s5442_s3 }
0x191f   :  { %v2078_v10 = vpop.trf.xlu0 }
0x1920   :  { %4780 = vmatmul.mubr.msk.f32.vlgmr.msra.gmra.mrb[26].mxu1 %vm704_vm9, %v2078_v10 }
0x1921   :  { %4784 = vmatprep.mubr.msk.f32.mxu1 %vm5437_vm0, %v5438_v1 }
0x193a   :  { %v2332_v39 = vpop.permute.xlu0 %2331 }
0x19f3   :  { %v2163_v12 = vpop.f32.mrb[26].mxu1 }
0x19f4   :  { %v2164_v14 = vadd.f32 %v2163_v12, %v5566_v57  ;;  %v4781_v15 = vpop.f32.mrb[27].mxu1 }
0x19f6   :  { %5335 = vtanh.f32 %v2164_v14 }
0x1a00   :  { %v5336_v16 = vpop.eup %5335 }
0x1a01   :  { %4783 = vmatpush3.msra.mxu1 %v5336_v16 }
0x1a02   :  { %4785 = vmatmul.mubr.msk.f32.vlgmr.msra.gmra.mrb[28].mxu1 %vm140_vm2, %v5569_v63  ;;  %5140 = vmatprep.subr.bf16.mxu1 %v5436_v0 }
0x1a03   :  { %5142 = vmatpush3.bf16.msra.mxu1 %v5576_v7  ;;  %4795 = vmatprep.mubr.msk.f32.mxu1 %vm5437_vm0, %v5438_v1 }
0x1a04   :  { %5143 = vmatprep.subr.bf16.mxu1 %v5436_v0 }
0x1a07   :  { %5145 = vmatpush3.bf16.msra.mxu1 %v5580_v11 }
0x1a08   :  { %5155 = vmatprep.subr.bf16.mxu1 %v5436_v0 }
0x1ad5   :  { %v2234_v17 = vpop.f32.mrb[28].mxu1 }
0x1ad6   :  { %v2238_v18 = vmul.f32 1.442695, %v2234_v17  ;;  %v4786_v19 = vpop.f32.mrb[29].mxu1 }
0x1ad8   :  { %5337 = vpow2.f32 %v2238_v18 }
0x1ae2   :  { %v5338_v21 = vpop.eup %5337 }
0x1ae3   :  { %v2242_v22 = vmul.f32 %v5338_v21, %v2240_v20  ;;  %v2324_v23 = vrot.slane %v5338_v21, %v5510_v29  ;;  %v2690_v21 = vrot.slane %v5551_v53, 4 }
0x1ae5   :  { %v2325_v24 = vmul.f32 %v2324_v23, %v5553_v56  ;;  %v2246_v25 = vrot.slane %v2242_v22, %v5510_v29 }
0x1ae7   :  { %v2326_v27 = vsel %vm942_vm10, %v2325_v24, 0.0  ;;  %v2247_v31 = vmul.f32 %v2246_v25, %v5553_v56 }
0x1ae8   :  { %2327 = vadd.xlane.f32.xlu1 %v2326_v27 }
0x1ae9   :  { %4796 = vmatmul.mubr.msk.f32.vlgmr.msra.gmra.mrb[30].mxu1 %vm66_vm1, %v2247_v31 }
0x1aea   :  { %5157 = vmatpush3.bf16.msra.mxu1 %v5517_v62  ;;  %4829 = vmatprep.mubr.msk.f32.mxu1 %vm5437_vm0, %v5438_v1 }
0x1aeb   :  { %5158 = vmatprep.subr.bf16.mxu1 %v5436_v0 }
0x1aee   :  { %5160 = vmatpush3.bf16.msra.mxu1 %v5520_v2 }
0x1aef   :  { %5161 = vmatprep.subr.bf16.mxu1 %v5436_v0 }
0x1af2   :  { %5163 = vmatpush3.bf16.msra.mxu1 %v5524_v5 }
0x1af3   :  { %5164 = vmatprep.subr.bf16.mxu1 %v5436_v0 }
0x1af6   :  { %5166 = vmatpush3.bf16.msra.mxu1 %v5528_v8 }
0x1af7   :  { %5173 = vmatprep.subr.bf16.mxu1 %v5436_v0 }
0x1b75   :  { %v2328_v32 = vpop.xlane.xlu1 %2327 }
0x1b76   :  { %5339 = vrcp.f32 %v2328_v32 }
0x1b80   :  { %v5340_v35 = vpop.eup %5339 }
0x1bbc   :  { %v2317_v36 = vpop.f32.mrb[30].mxu1 }
0x1bbd   :  { %v2330_v37 = vmul.f32 %v5340_v35, %v2317_v36  ;;  %v4797_v38 = vpop.f32.mrb[31].mxu1 }
0x1bbf   :  { %v2334_v40 = vsel %vm948_vm11, %v2330_v37, %v2332_v39 }
0x1bc0   :  { %4811 = vmatmul.mubr.msk.f32.vlgmr.msra.gmra.mrb[18].mxu0 %vm954_vm12, %v2334_v40 }
0x1bc1   :  { %4833 = vmatpush3.msk.msra.mxu0 %vm708_vm8, %v5553_v56  ;;  %4834 = vmatprep.mubr.msk.f32.mxu0 %vm5437_vm0, %v5438_v1 }
0x1bc2   :  { %4837 = vmatprep.subr.mxu0 %v5438_v1 }
0x1c93   :  { %v2404_v42 = vpop.f32.mrb[18].mxu0 }
0x1c94   :  { %v2405_v43 = vadd.f32 %v5620_v41, %v2404_v42  ;;  %v4812_v44 = vpop.f32.mrb[19].mxu0 }
0x1c96   :  { %5341 = vtanh.f32 %v2405_v43  ;;  %v4305_v46 = vmul.f32 -1.442695, %v2405_v43 }
0x1c98   :  { %5343 = vpow2.f32 %v4305_v46 }
0x1ca0   :  { %v5342_v45 = vpop.eup %5341 }
0x1ca1   :  { %2417 = vrot.lane.b32.xlu1 %v5342_v45, %s5440_s0 }
0x1ca2   :  { %v5344_v47 = vpop.eup %5343 }
0x1ca3   :  { %v2411_v48 = vadd.f32 1.0, %v5344_v47 }
0x1ca5   :  { %5345 = vrcp.f32 %v2411_v48 }
0x1caf   :  { %v5346_v49 = vpop.eup %5345 }
0x1cb0   :  { %v2415_v52 = vmul.f32 %v5346_v49, %v5755_v4 }
0x1d13   :  { %v2418_v50 = vpop.permute.xlu1 %2417 }
0x1d14   :  { %v2420_v51 = vmul.f32 %v5346_v49, %v2418_v50 }
0x1d16   :  { %2422 = vrot.lane.b32.xlu1 %v2420_v51, %s5441_s30 }
0x1d88   :  { %v2423_v54 = vpop.permute.xlu1 %2422 }
0x1d89   :  { %v2425_v55 = vadd.f32 %v2423_v54, %v2415_v52 }
0x1d8b   :  { %5347 = vtanh.f32 %v2425_v55 }
0x1d95   :  { %v5348_v13 = vpop.eup %5347 }
0x1d96   :  { %2428 = vrot.lane.b32.xlu1 %v5348_v13, %s5440_s0 }
0x1e08   :  { %v2429_v61 = vpop.permute.xlu1 %2428 }
0x1e09   :  { %v5812_v3 = vmul.f32 %v5346_v49, %v2429_v61 }
0x1e0b   :  { %2433 = vrot.lane.b32.xlu1 %v5812_v3, %s5441_s30 }
0x1e7d   :  { %v2434_v6 = vpop.permute.xlu1 %2433 }
0x1e7e   :  { %v5817_v9 = vsel %vm66_vm1, %v2434_v6, %v2425_v55 }
0x1e7f   :  { %4830 = vmatmul.mubr.msk.f32.vlgmr.msra.gmra.mrb[32].mxu1 %vm598_vm13, %v5817_v9 }
0x1e80   :  { %5175 = vmatpush3.bf16.msra.mxu1 %v5600_v26  ;;  %4865 = vmatprep.mubr.msk.f32.mxu1 %vm5437_vm0, %v5438_v1 }
0x1e81   :  { %5176 = vmatprep.subr.bf16.mxu1 %v5436_v0 }
0x1e84   :  { %5178 = vmatpush3.bf16.msra.mxu1 %v5604_v30 }
0x1e85   :  { %5179 = vmatprep.subr.bf16.mxu1 %v5436_v0 }
0x1e88   :  { %5181 = vmatpush3.bf16.msra.mxu1 %v5609_v34 }
0x1e89   :  { %4887 = vmatprep.subr.mxu1 %v5438_v1 }
0x1f52   :  { %v2508_v4 = vpop.f32.mrb[32].mxu1 }
0x1f53   :  { %v2509_v10 = vadd.f32 %v5540_v33, %v2508_v4  ;;  %v4831_v12 = vpop.f32.mrb[33].mxu1 }
0x1f54   :  { %v5891_v12 = vld [vmem:[#allocation2 + $0xe0] ss:$0 sm:$0xff] }
0x1f55   :  { %2512 = vxpose.xlu1.b32.start.end [1/1] (short) (narrow) %v2509_v10, 8 }
0x1fd5   :  { %v2528_v14 = vpop.trf.xlu1 }
0x1fd6   :  { %4835 = vmatmul.mubr.msk.f32.vlgmr.msra.gmra.mrb[20].mxu0 %vm704_vm9, %v2528_v14 }
0x1fd7   :  { %4839 = vmatprep.mubr.msk.f32.mxu0 %vm5437_vm0, %v5438_v1 }
0x20a9   :  { %v2613_v15 = vpop.f32.mrb[20].mxu0 }
0x20aa   :  { %v2614_v16 = vadd.f32 %v2613_v15, %v5566_v57  ;;  %v4836_v17 = vpop.f32.mrb[21].mxu0 }
0x20ac   :  { %5349 = vtanh.f32 %v2614_v16 }
0x20b6   :  { %v5350_v18 = vpop.eup %5349 }
0x20b7   :  { %4838 = vmatpush3.msra.mxu0 %v5350_v18 }
0x20b8   :  { %4840 = vmatmul.mubr.msk.f32.vlgmr.msra.gmra.mrb[22].mxu0 %vm140_vm2, %v5569_v63  ;;  %5167 = vmatprep.subr.bf16.mxu0 %v5436_v0 }
0x20b9   :  { %5169 = vmatpush3.bf16.msra.mxu0 %v5576_v7  ;;  %4850 = vmatprep.mubr.msk.f32.mxu0 %vm5437_vm0, %v5438_v1 }
0x20ba   :  { %5170 = vmatprep.subr.bf16.mxu0 %v5436_v0 }
0x20bd   :  { %5172 = vmatpush3.bf16.msra.mxu0 %v5580_v11 }
0x20be   :  { %5182 = vmatprep.subr.bf16.mxu0 %v5436_v0 }
0x218b   :  { %v2684_v33 = vpop.f32.mrb[22].mxu0 }
0x218c   :  { %v2688_v19 = vmul.f32 1.442695, %v2684_v33  ;;  %v4841_v20 = vpop.f32.mrb[23].mxu0 }
0x218e   :  { %5351 = vpow2.f32 %v2688_v19 }
0x2198   :  { %v5352_v22 = vpop.eup %5351 }
0x2199   :  { %v2692_v23 = vmul.f32 %v5352_v22, %v2690_v21  ;;  %v2774_v24 = vrot.slane %v5352_v22, %v5510_v29 }
0x219b   :  { %v2775_v25 = vmul.f32 %v2774_v24, %v5553_v56  ;;  %v2696_v27 = vrot.slane %v2692_v23, %v5510_v29  ;;  %v3149_v23 = vrot.slane %v5551_v53, 5 }
0x219d   :  { %v2776_v31 = vsel %vm942_vm10, %v2775_v25, 0.0  ;;  %v2697_v32 = vmul.f32 %v2696_v27, %v5553_v56  ;;  %v5911_v27 = vld [vmem:[#allocation2 + $0xd8] sm:$0x3] }
0x219e   :  { %2777 = vadd.xlane.f32.xlu0 %v2776_v31 }
0x219f   :  { %4851 = vmatmul.mubr.msk.f32.vlgmr.msra.gmra.mrb[24].mxu0 %vm66_vm1, %v2697_v32 }
0x21a0   :  { %5184 = vmatpush3.bf16.msra.mxu0 %v5517_v62  ;;  %4884 = vmatprep.mubr.msk.f32.mxu0 %vm5437_vm0, %v5438_v1 }
0x21a1   :  { %5185 = vmatprep.subr.bf16.mxu0 %v5436_v0 }
0x21a4   :  { %5187 = vmatpush3.bf16.msra.mxu0 %v5520_v2 }
0x21a5   :  { %5188 = vmatprep.subr.bf16.mxu0 %v5436_v0 }
0x21a8   :  { %5190 = vmatpush3.bf16.msra.mxu0 %v5524_v5 }
0x21a9   :  { %5191 = vmatprep.subr.bf16.mxu0 %v5436_v0 }
0x21ac   :  { %5193 = vmatpush3.bf16.msra.mxu0 %v5528_v8 }
0x21ad   :  { %5200 = vmatprep.subr.bf16.mxu0 %v5436_v0 }
0x21b4   :  { %2781 = vrot.lane.b32.xlu0 %v5817_v9, %s5442_s3 }
0x222b   :  { %v2778_v35 = vpop.xlane.xlu0 %2777 }
0x222c   :  { %5353 = vrcp.f32 %v2778_v35 }
0x222f   :  { %v2782_v40 = vpop.permute.xlu0 %2781 }
0x2236   :  { %v5354_v36 = vpop.eup %5353 }
0x2272   :  { %v2767_v37 = vpop.f32.mrb[24].mxu0 }
0x2273   :  { %v2780_v38 = vmul.f32 %v5354_v36, %v2767_v37  ;;  %v4852_v39 = vpop.f32.mrb[25].mxu0 }
0x2275   :  { %v2784_v42 = vsel %vm948_vm11, %v2780_v38, %v2782_v40 }
0x2276   :  { %4866 = vmatmul.mubr.msk.f32.vlgmr.msra.gmra.mrb[34].mxu1 %vm954_vm12, %v2784_v42 }
0x2277   :  { %4888 = vmatpush3.msk.msra.mxu1 %vm708_vm8, %v5553_v56  ;;  %4889 = vmatprep.mubr.msk.f32.mxu1 %vm5437_vm0, %v5438_v1 }
0x2278   :  { %4892 = vmatprep.subr.mxu1 %v5438_v1 }
0x2349   :  { %v2854_v43 = vpop.f32.mrb[34].mxu1 }
0x234a   :  { %v2855_v44 = vadd.f32 %v5620_v41, %v2854_v43  ;;  %v4867_v45 = vpop.f32.mrb[35].mxu1 }
0x234c   :  { %5355 = vtanh.f32 %v2855_v44  ;;  %v4312_v47 = vmul.f32 -1.442695, %v2855_v44 }
0x234e   :  { %5357 = vpow2.f32 %v4312_v47 }
0x2356   :  { %v5356_v46 = vpop.eup %5355 }
0x2357   :  { %2867 = vrot.lane.b32.xlu1 %v5356_v46, %s5440_s0 }
0x2358   :  { %v5358_v48 = vpop.eup %5357 }
0x2359   :  { %v2861_v49 = vadd.f32 1.0, %v5358_v48 }
0x235b   :  { %5359 = vrcp.f32 %v2861_v49 }
0x2365   :  { %v5360_v50 = vpop.eup %5359 }
0x2366   :  { %v2865_v52 = vmul.f32 %v5360_v50, %v5817_v9 }
0x23c9   :  { %v2868_v56 = vpop.permute.xlu1 %2867 }
0x23ca   :  { %v2870_v51 = vmul.f32 %v5360_v50, %v2868_v56 }
0x23cc   :  { %2872 = vrot.lane.b32.xlu0 %v2870_v51, %s5441_s30 }
0x243e   :  { %v2873_v54 = vpop.permute.xlu0 %2872 }
0x243f   :  { %v2875_v55 = vadd.f32 %v2873_v54, %v2865_v52 }
0x2441   :  { %5361 = vtanh.f32 %v2875_v55 }
0x244b   :  { %v5362_v13 = vpop.eup %5361 }
0x244c   :  { %2878 = vrot.lane.b32.xlu0 %v5362_v13, %s5440_s0 }
0x24be   :  { %v2879_v61 = vpop.permute.xlu0 %2878 }
0x24bf   :  { %v5874_v6 = vmul.f32 %v5360_v50, %v2879_v61 }
0x24c1   :  { %2883 = vrot.lane.b32.xlu0 %v5874_v6, %s5441_s30 }
0x2533   :  { %v2884_v4 = vpop.permute.xlu0 %2883 }
0x2534   :  { %v5879_v10 = vsel %vm66_vm1, %v2884_v4, %v2875_v55 }
0x2535   :  { %4885 = vmatmul.mubr.msk.f32.vlgmr.msra.gmra.mrb[26].mxu0 %vm598_vm13, %v5879_v10 }
0x2536   :  { %5202 = vmatpush3.bf16.msra.mxu0 %v5600_v26  ;;  %4920 = vmatprep.mubr.msk.f32.mxu0 %vm5437_vm0, %v5438_v1 }
0x2537   :  { %5203 = vmatprep.subr.bf16.mxu0 %v5436_v0 }
0x253a   :  { %5205 = vmatpush3.bf16.msra.mxu0 %v5604_v30 }
0x253b   :  { %5206 = vmatprep.subr.bf16.mxu0 %v5436_v0 }
0x253e   :  { %5208 = vmatpush3.bf16.msra.mxu0 %v5609_v34 }
0x253f   :  { %4942 = vmatprep.subr.mxu0 %v5438_v1 }
0x2608   :  { %v2967_v9 = vpop.f32.mrb[26].mxu0 }
0x2609   :  { %v2968_v14 = vadd.f32 %v5891_v12, %v2967_v9  ;;  %v4886_v15 = vpop.f32.mrb[27].mxu0 }
0x260b   :  { %2971 = vxpose.xlu0.b32.start.end [1/1] (short) (narrow) %v2968_v14, 8 }
0x2634   :  { %3240 = vrot.lane.b32.xlu0 %v5879_v10, %s5442_s3 }
0x268b   :  { %v2987_v16 = vpop.trf.xlu0 }
0x268c   :  { %4890 = vmatmul.mubr.msk.f32.vlgmr.msra.gmra.mrb[36].mxu1 %vm704_vm9, %v2987_v16 }
0x268d   :  { %4894 = vmatprep.mubr.msk.f32.mxu1 %vm5437_vm0, %v5438_v1 }
0x26a6   :  { %v3241_v43 = vpop.permute.xlu0 %3240 }
0x275f   :  { %v3072_v17 = vpop.f32.mrb[36].mxu1 }
0x2760   :  { %v3073_v18 = vadd.f32 %v3072_v17, %v5566_v57  ;;  %v4891_v33 = vpop.f32.mrb[37].mxu1 }
0x2762   :  { %5363 = vtanh.f32 %v3073_v18 }
0x276c   :  { %v5364_v19 = vpop.eup %5363 }
0x276d   :  { %4893 = vmatpush3.msra.mxu1 %v5364_v19 }
0x276e   :  { %4895 = vmatmul.mubr.msk.f32.vlgmr.msra.gmra.mrb[38].mxu1 %vm140_vm2, %v5569_v63  ;;  %5194 = vmatprep.subr.bf16.mxu1 %v5436_v0 }
0x276f   :  { %5196 = vmatpush3.bf16.msra.mxu1 %v5576_v7  ;;  %4905 = vmatprep.mubr.msk.f32.mxu1 %vm5437_vm0, %v5438_v1 }
0x2770   :  { %5197 = vmatprep.subr.bf16.mxu1 %v5436_v0 }
0x2773   :  { %5199 = vmatpush3.bf16.msra.mxu1 %v5580_v11 }
0x2774   :  { %5209 = vmatprep.subr.bf16.mxu1 %v5436_v0 }
0x2841   :  { %v3143_v20 = vpop.f32.mrb[38].mxu1 }
0x2842   :  { %v3147_v21 = vmul.f32 1.442695, %v3143_v20  ;;  %v4896_v22 = vpop.f32.mrb[39].mxu1 }
0x2843   :  { %v5962_v22 = vld [vmem:[#allocation2 + $0xf0] sm:$0x1] }
0x2844   :  { %5365 = vpow2.f32 %v3147_v21 }
0x284e   :  { %v5366_v63 = vpop.eup %5365 }
0x284f   :  { %v3151_v24 = vmul.f32 %v5366_v63, %v3149_v23  ;;  %v3233_v25 = vrot.slane %v5366_v63, %v5510_v29 }
0x2851   :  { %v3234_v31 = vmul.f32 %v5911_v27, %v3233_v25  ;;  %v3155_v32 = vrot.slane %v3151_v24, %v5510_v29  ;;  %v3608_v25 = vrot.slane %v5551_v53, 6 }
0x2853   :  { %v3235_v35 = vsel %vm942_vm10, %v3234_v31, 0.0  ;;  %v3156_v36 = vmul.f32 %v5911_v27, %v3155_v32 }
0x2854   :  { %3236 = vadd.xlane.f32.xlu1 %v3235_v35 }
0x2855   :  { %4906 = vmatmul.mubr.msk.f32.vlgmr.msra.gmra.mrb[40].mxu1 %vm66_vm1, %v3156_v36 }
0x2856   :  { %5211 = vmatpush3.bf16.msra.mxu1 %v5517_v62  ;;  %4939 = vmatprep.mubr.msk.f32.mxu1 %vm5437_vm0, %v5438_v1 }
0x2857   :  { %5212 = vmatprep.subr.bf16.mxu1 %v5436_v0 }
0x285a   :  { %5214 = vmatpush3.bf16.msra.mxu1 %v5520_v2 }
0x285b   :  { %5215 = vmatprep.subr.bf16.mxu1 %v5436_v0 }
0x285e   :  { %5217 = vmatpush3.bf16.msra.mxu1 %v5524_v5 }
0x285f   :  { %5218 = vmatprep.subr.bf16.mxu1 %v5436_v0 }
0x2862   :  { %5220 = vmatpush3.bf16.msra.mxu1 %v5528_v8 }
0x2863   :  { %5227 = vmatprep.subr.bf16.mxu1 %v5436_v0 }
0x28e1   :  { %v3237_v37 = vpop.xlane.xlu1 %3236 }
0x28e2   :  { %5367 = vrcp.f32 %v3237_v37 }
0x28ec   :  { %v5368_v38 = vpop.eup %5367 }
0x2928   :  { %v3226_v39 = vpop.f32.mrb[40].mxu1 }
0x2929   :  { %v3239_v40 = vmul.f32 %v5368_v38, %v3226_v39  ;;  %v4907_v42 = vpop.f32.mrb[41].mxu1 }
0x292b   :  { %v3243_v44 = vsel %vm948_vm11, %v3239_v40, %v3241_v43 }
0x292c   :  { %4921 = vmatmul.mubr.msk.f32.vlgmr.msra.gmra.mrb[28].mxu0 %vm954_vm12, %v3243_v44 }
0x292d   :  { %4943 = vmatpush3.msk.msra.mxu0 %vm708_vm8, %v5911_v27  ;;  %4944 = vmatprep.mubr.msk.f32.mxu0 %vm5437_vm0, %v5438_v1 }
0x292e   :  { %4947 = vmatprep.subr.mxu0 %v5438_v1 }
0x29ff   :  { %v3313_v45 = vpop.f32.mrb[28].mxu0 }
0x2a00   :  { %v3314_v46 = vadd.f32 %v5620_v41, %v3313_v45  ;;  %v4922_v47 = vpop.f32.mrb[29].mxu0 }
0x2a02   :  { %5369 = vtanh.f32 %v3314_v46  ;;  %v4319_v49 = vmul.f32 -1.442695, %v3314_v46 }
0x2a04   :  { %5371 = vpow2.f32 %v4319_v49 }
0x2a0c   :  { %v5370_v48 = vpop.eup %5369 }
0x2a0d   :  { %3326 = vrot.lane.b32.xlu1 %v5370_v48, %s5440_s0 }
0x2a0e   :  { %v5372_v50 = vpop.eup %5371 }
0x2a0f   :  { %v3320_v56 = vadd.f32 1.0, %v5372_v50 }
0x2a11   :  { %5373 = vrcp.f32 %v3320_v56 }
0x2a1b   :  { %v5374_v51 = vpop.eup %5373 }
0x2a1c   :  { %v3324_v55 = vmul.f32 %v5374_v51, %v5879_v10 }
0x2a7f   :  { %v3327_v52 = vpop.permute.xlu1 %3326 }
0x2a80   :  { %v3329_v54 = vmul.f32 %v5374_v51, %v3327_v52 }
0x2a82   :  { %3331 = vrot.lane.b32.xlu1 %v3329_v54, %s5441_s30 }
0x2af4   :  { %v3332_v13 = vpop.permute.xlu1 %3331 }
0x2af5   :  { %v3334_v61 = vadd.f32 %v3332_v13, %v3324_v55 }
0x2af7   :  { %5375 = vtanh.f32 %v3334_v61 }
0x2b01   :  { %v5376_v41 = vpop.eup %5375 }
0x2b02   :  { %3337 = vrot.lane.b32.xlu1 %v5376_v41, %s5440_s0 }
0x2b74   :  { %v3338_v4 = vpop.permute.xlu1 %3337 }
0x2b75   :  { %v5940_v9 = vmul.f32 %v5374_v51, %v3338_v4 }
0x2b77   :  { %3342 = vrot.lane.b32.xlu1 %v5940_v9, %s5441_s30 }
0x2be9   :  { %v3343_v14 = vpop.permute.xlu1 %3342 }
0x2bea   :  { %v5945_v15 = vsel %vm66_vm1, %v3343_v14, %v3334_v61 }
0x2beb   :  { %4940 = vmatmul.mubr.msk.f32.vlgmr.msra.gmra.mrb[42].mxu1 %vm598_vm13, %v5945_v15 }
0x2bec   :  { %5229 = vmatpush3.bf16.msra.mxu1 %v5600_v26  ;;  %4975 = vmatprep.mubr.msk.f32.mxu1 %vm5437_vm0, %v5438_v1 }
0x2bed   :  { %5230 = vmatprep.subr.bf16.mxu1 %v5436_v0 }
0x2bf0   :  { %5232 = vmatpush3.bf16.msra.mxu1 %v5604_v30 }
0x2bf1   :  { %5233 = vmatprep.subr.bf16.mxu1 %v5436_v0 }
0x2bf4   :  { %5235 = vmatpush3.bf16.msra.mxu1 %v5609_v34 }
0x2bf5   :  { %4997 = vmatprep.subr.mxu1 %v5438_v1 }
0x2cbe   :  { %v3426_v10 = vpop.f32.mrb[42].mxu1 }
0x2cbf   :  { %v3427_v16 = vadd.f32 %v5891_v12, %v3426_v10  ;;  %v4941_v17 = vpop.f32.mrb[43].mxu1 }
0x2cc1   :  { %3430 = vxpose.xlu1.b32.start.end [1/1] (short) (narrow) %v3427_v16, 8 }
0x2d41   :  { %v3446_v18 = vpop.trf.xlu1 }
0x2d42   :  { %4945 = vmatmul.mubr.msk.f32.vlgmr.msra.gmra.mrb[30].mxu0 %vm704_vm9, %v3446_v18 }
0x2d43   :  { %4949 = vmatprep.mubr.msk.f32.mxu0 %vm5437_vm0, %v5438_v1 }
0x2e15   :  { %v3531_v33 = vpop.f32.mrb[30].mxu0 }
0x2e16   :  { %v3532_v19 = vadd.f32 %v3531_v33, %v5566_v57  ;;  %v4946_v20 = vpop.f32.mrb[31].mxu0  ;;  %v5443_v33 = vmov 1983009808  }
0x2e18   :  { %5377 = vtanh.f32 %v3532_v19  ;;  %v1058_v19 = vunpack.c.l.s4 %v5443_v33 }
0x2e1a   :  { %v1059_v20 = vunpack.c.0.s8 %v1058_v19 }
0x2e22   :  { %v5378_v21 = vpop.eup %5377 }
0x2e23   :  { %4948 = vmatpush3.msra.mxu0 %v5378_v21 }
0x2e24   :  { %4950 = vmatmul.mubr.msk.f32.vlgmr.msra.gmra.mrb[32].mxu0 %vm140_vm2, %v5962_v22  ;;  %5221 = vmatprep.subr.bf16.mxu0 %v5436_v0 }
0x2e25   :  { %5223 = vmatpush3.bf16.msra.mxu0 %v5576_v7  ;;  %4960 = vmatprep.mubr.msk.f32.mxu0 %vm5437_vm0, %v5438_v1 }
0x2e26   :  { %5224 = vmatprep.subr.bf16.mxu0 %v5436_v0 }
0x2e29   :  { %5226 = vmatpush3.bf16.msra.mxu0 %v5580_v11 }
0x2e2a   :  { %5236 = vmatprep.subr.bf16.mxu0 %v5436_v0 }
0x2ef7   :  { %v3602_v23 = vpop.f32.mrb[32].mxu0 }
0x2ef8   :  { %v3606_v63 = vmul.f32 1.442695, %v3602_v23  ;;  %v4951_v24 = vpop.f32.mrb[33].mxu0 }
0x2ef9   :  { %v4067_v24 = vrot.slane %v5551_v53, 7 }
0x2efa   :  { %5379 = vpow2.f32 %v3606_v63 }
0x2f04   :  { %v5380_v31 = vpop.eup %5379 }
0x2f05   :  { %v3610_v32 = vmul.f32 %v5380_v31, %v3608_v25  ;;  %v3692_v35 = vrot.slane %v5380_v31, %v5510_v29 }
0x2f07   :  { %v3693_v36 = vmul.f32 %v5911_v27, %v3692_v35  ;;  %v3614_v37 = vrot.slane %v3610_v32, %v5510_v29 }
0x2f09   :  { %v3694_v38 = vsel %vm942_vm10, %v3693_v36, 0.0  ;;  %v3615_v39 = vmul.f32 %v5911_v27, %v3614_v37 }
0x2f0a   :  { %3695 = vadd.xlane.f32.xlu0 %v3694_v38 }
0x2f0b   :  { %4961 = vmatmul.mubr.msk.f32.vlgmr.msra.gmra.mrb[34].mxu0 %vm66_vm1, %v3615_v39 }
0x2f0c   :  { %5238 = vmatpush3.bf16.msra.mxu0 %v5517_v62  ;;  %4994 = vmatprep.mubr.msk.f32.mxu0 %vm5437_vm0, %v5438_v1 }
0x2f0d   :  { %5239 = vmatprep.subr.bf16.mxu0 %v5436_v0 }
0x2f10   :  { %5241 = vmatpush3.bf16.msra.mxu0 %v5520_v2 }
0x2f11   :  { %5242 = vmatprep.subr.bf16.mxu0 %v5436_v0 }
0x2f14   :  { %5244 = vmatpush3.bf16.msra.mxu0 %v5524_v5 }
0x2f15   :  { %5245 = vmatprep.subr.bf16.mxu0 %v5436_v0 }
0x2f18   :  { %5247 = vmatpush3.bf16.msra.mxu0 %v5528_v8  ;;  %v5999_v8 = vld [vmem:[#allocation2 + $0xf8] ss:$0 sm:$0xff] }
0x2f19   :  { %5254 = vmatprep.subr.bf16.mxu0 %v5436_v0 }
0x2f20   :  { %3699 = vrot.lane.b32.xlu0 %v5945_v15, %s5442_s3 }
0x2f97   :  { %v3696_v62 = vpop.xlane.xlu0 %3695 }
0x2f98   :  { %5381 = vrcp.f32 %v3696_v62 }
0x2f9b   :  { %v3700_v2 = vpop.permute.xlu0 %3699 }
0x2fa2   :  { %v5382_v40 = vpop.eup %5381 }
0x2fde   :  { %v3685_v42 = vpop.f32.mrb[34].mxu0 }
0x2fdf   :  { %v3698_v43 = vmul.f32 %v5382_v40, %v3685_v42  ;;  %v4962_v44 = vpop.f32.mrb[35].mxu0 }
0x2fe1   :  { %v3702_v45 = vsel %vm948_vm11, %v3698_v43, %v3700_v2 }
0x2fe2   :  { %4976 = vmatmul.mubr.msk.f32.vlgmr.msra.gmra.mrb[44].mxu1 %vm954_vm12, %v3702_v45 }
0x2fe3   :  { %4998 = vmatpush3.msk.msra.mxu1 %vm708_vm8, %v5911_v27  ;;  %4999 = vmatprep.mubr.msk.f32.mxu1 %vm5437_vm0, %v5438_v1 }
0x2fe4   :  { %5002 = vmatprep.subr.mxu1 %v5438_v1 }
0x30b5   :  { %v3772_v5 = vpop.f32.mrb[44].mxu1 }
0x30b6   :  { %v3773_v46 = vadd.f32 %v5999_v8, %v3772_v5  ;;  %v4977_v47 = vpop.f32.mrb[45].mxu1 }
0x30b8   :  { %5383 = vtanh.f32 %v3773_v46  ;;  %v4326_v49 = vmul.f32 -1.442695, %v3773_v46 }
0x30ba   :  { %5385 = vpow2.f32 %v4326_v49 }
0x30c2   :  { %v5384_v48 = vpop.eup %5383 }
0x30c3   :  { %3785 = vrot.lane.b32.xlu1 %v5384_v48, %s5440_s0 }
0x30c4   :  { %v5386_v50 = vpop.eup %5385 }
0x30c5   :  { %v3779_v56 = vadd.f32 1.0, %v5386_v50 }
0x30c7   :  { %5387 = vrcp.f32 %v3779_v56 }
0x30d1   :  { %v5388_v51 = vpop.eup %5387 }
0x30d2   :  { %v3783_v55 = vmul.f32 %v5388_v51, %v5945_v15 }
0x3135   :  { %v3786_v52 = vpop.permute.xlu1 %3785 }
0x3136   :  { %v3788_v54 = vmul.f32 %v5388_v51, %v3786_v52 }
0x3138   :  { %3790 = vrot.lane.b32.xlu0 %v3788_v54, %s5441_s30 }
0x31aa   :  { %v3791_v13 = vpop.permute.xlu0 %3790 }
0x31ab   :  { %v3793_v61 = vadd.f32 %v3791_v13, %v3783_v55 }
0x31ad   :  { %5389 = vtanh.f32 %v3793_v61 }
0x31b7   :  { %v5390_v41 = vpop.eup %5389 }
0x31b8   :  { %3796 = vrot.lane.b32.xlu0 %v5390_v41, %s5440_s0 }
0x322a   :  { %v3797_v4 = vpop.permute.xlu0 %3796 }
0x322b   :  { %v6006_v14 = vmul.f32 %v5388_v51, %v3797_v4 }
0x322d   :  { %3801 = vrot.lane.b32.xlu0 %v6006_v14, %s5441_s30 }
0x329f   :  { %v3802_v10 = vpop.permute.xlu0 %3801 }
0x32a0   :  { %v6011_v16 = vsel %vm66_vm1, %v3802_v10, %v3793_v61 }
0x32a1   :  { %4995 = vmatmul.mubr.msk.f32.vlgmr.msra.gmra.mrb[36].mxu0 %vm598_vm13, %v6011_v16 }
0x32a2   :  { %5256 = vmatpush3.bf16.msra.mxu0 %v5600_v26  ;;  %5030 = vmatprep.mubr.msk.f32.mxu0 %vm5437_vm0, %v5438_v1  ;;  %v6024_v26 = vsub.s32 %v1059_v20, %v5507_v28 }
0x32a3   :  { %5257 = vmatprep.subr.bf16.mxu0 %v5436_v0 }
0x32a4   :  { %v1063_v46 = vrot.slane %v5626_v59, %v6024_v26  ;;  %v1523_v47 = vrot.slane %v5688_v58, %v6024_v26  ;;  %v3811_v54 = vrot.slane %v6006_v14, %v6024_v26 }
0x32a6   :  { %5259 = vmatpush3.bf16.msra.mxu0 %v5604_v30  ;;  %v3352_v30 = vrot.slane %v5940_v9, %v6024_v26 }
0x32a7   :  { %5260 = vmatprep.subr.bf16.mxu0 %v5436_v0 }
0x32aa   :  { %5262 = vmatpush3.bf16.msra.mxu0 %v5609_v34  ;;  %v1983_v34 = vrot.slane %v5750_v60, %v6024_v26 }
0x3374   :  { %v3885_v15 = vpop.f32.mrb[36].mxu0 }
0x3375   :  { %v3886_v17 = vadd.f32 %v5891_v12, %v3885_v15  ;;  %v4996_v18 = vpop.f32.mrb[37].mxu0 }
0x3377   :  { %3889 = vxpose.xlu0.b32.start.end [1/1] (short) (narrow) %v3886_v17, 8 }
0x33a0   :  { %4158 = vrot.lane.b32.xlu0 %v6011_v16, %s5442_s3 }
0x33a4   :  { %3353 = vrot.lane.b32.xlu0 %v3352_v30, %s5440_s0 }
0x33a8   :  { %1984 = vrot.lane.b32.xlu0 %v1983_v34, %s5444_s4 }
0x33f7   :  { %v3905_v12 = vpop.trf.xlu0 }
0x33f8   :  { %5000 = vmatmul.mubr.msk.f32.vlgmr.msra.gmra.mrb[46].mxu1 %vm704_vm9, %v3905_v12 }
0x33f9   :  { %5004 = vmatprep.mubr.msk.f32.mxu1 %vm5437_vm0, %v5438_v1 }
0x3412   :  { %v4159_v38 = vpop.permute.xlu0 %4158 }
0x3416   :  { %v3354_v59 = vpop.permute.xlu0 %3353 }
0x341a   :  { %v1985_v52 = vpop.permute.xlu0 %1984 }
0x34cb   :  { %v3990_v28 = vpop.f32.mrb[46].mxu1 }
0x34cc   :  { %v3991_v21 = vadd.f32 %v3990_v28, %v5566_v57  ;;  %v5001_v23 = vpop.f32.mrb[47].mxu1 }
0x34ce   :  { %5391 = vtanh.f32 %v3991_v21 }
0x34d8   :  { %v5392_v9 = vpop.eup %5391 }
0x34d9   :  { %5003 = vmatpush3.msra.mxu1 %v5392_v9 }
0x34da   :  { %5005 = vmatmul.mubr.msk.f32.vlgmr.msra.gmra.mrb[48].mxu1 %vm140_vm2, %v5962_v22  ;;  %5248 = vmatprep.subr.bf16.mxu1 %v5436_v0 }
0x34db   :  { %5250 = vmatpush3.bf16.msra.mxu1 %v5576_v7  ;;  %5015 = vmatprep.mubr.msk.f32.mxu1 %vm5437_vm0, %v5438_v1  ;;  %vm2437_vm0 = vcmask 1042176  }
0x34dc   :  { %5251 = vmatprep.subr.bf16.mxu1 %v5436_v0 }
0x34df   :  { %5253 = vmatpush3.bf16.msra.mxu1 %v5580_v11 }
0x35ad   :  { %v4061_v60 = vpop.f32.mrb[48].mxu1 }
0x35ae   :  { %v4065_v57 = vmul.f32 1.442695, %v4061_v60  ;;  %v5006_v63 = vpop.f32.mrb[49].mxu1 }
0x35b0   :  { %5393 = vpow2.f32 %v4065_v57 }
0x35ba   :  { %v5394_v25 = vpop.eup %5393 }
0x35bb   :  { %v4069_v31 = vmul.f32 %v5394_v25, %v4067_v24  ;;  %v4151_v22 = vrot.slane %v5394_v25, %v5510_v29 }
0x35bd   :  { %v4073_v32 = vrot.slane %v4069_v31, %v5510_v29  ;;  %v4152_v7 = vmul.f32 %v5911_v27, %v4151_v22 }
0x35bf   :  { %v4074_v1 = vmul.f32 %v5911_v27, %v4073_v32  ;;  %v4153_v0 = vsel %vm942_vm10, %v4152_v7, 0.0 }
0x35c0   :  { %4154 = vadd.xlane.f32.xlu1 %v4153_v0 }
0x35c1   :  { %5016 = vmatmul.mubr.msk.f32.vlgmr.msra.gmra.mrb[50].mxu1 %vm66_vm1, %v4074_v1 }
0x364d   :  { %v4155_v11 = vpop.xlane.xlu1 %4154 }
0x364e   :  { %5395 = vrcp.f32 %v4155_v11 }
0x3658   :  { %v5396_v35 = vpop.eup %5395 }
0x3694   :  { %v4144_v36 = vpop.f32.mrb[50].mxu1 }
0x3695   :  { %v4157_v53 = vmul.f32 %v5396_v35, %v4144_v36  ;;  %v5017_v37 = vpop.f32.mrb[51].mxu1 }
0x3697   :  { %v4161_v39 = vsel %vm948_vm11, %v4157_v53, %v4159_v38 }
0x3698   :  { %5031 = vmatmul.mubr.msk.f32.vlgmr.msra.gmra.mrb[38].mxu0 %vm954_vm12, %v4161_v39 }
0x376b   :  { %v4231_v29 = vpop.f32.mrb[38].mxu0 }
0x376c   :  { %v4232_v62 = vadd.f32 %v5999_v8, %v4231_v29  ;;  %v5032_v27 = vpop.f32.mrb[39].mxu0  ;;  %v2893_v8 = vrot.slane %v5874_v6, %v6024_v26 }
0x376e   :  { %5397 = vtanh.f32 %v4232_v62  ;;  %v4333_v42 = vmul.f32 -1.442695, %v4232_v62 }
0x3770   :  { %5399 = vpow2.f32 %v4333_v42 }
0x3778   :  { %v5398_v40 = vpop.eup %5397 }
0x3779   :  { %4244 = vrot.lane.b32.xlu1 %v5398_v40, %s5440_s0 }
0x377a   :  { %v5400_v43 = vpop.eup %5399 }
0x377b   :  { %v4238_v44 = vadd.f32 1.0, %v5400_v43 }
0x377d   :  { %5401 = vrcp.f32 %v4238_v44 }
0x3787   :  { %v5402_v2 = vpop.eup %5401 }
0x3788   :  { %v4242_v48 = vmul.f32 %v5402_v2, %v6011_v16 }
0x37eb   :  { %v4245_v45 = vpop.permute.xlu1 %4244 }
0x37ec   :  { %v4247_v5 = vmul.f32 %v5402_v2, %v4245_v45 }
0x37ee   :  { %4249 = vrot.lane.b32.xlu1 %v4247_v5, %s5441_s30 }
0x37f2   :  { %1064 = vrot.lane.b32.xlu1 %v1063_v46, %s5441_s30 }
0x37f6   :  { %2894 = vrot.lane.b32.xlu1 %v2893_v8, %s5441_s30 }
0x37fa   :  { %1524 = vrot.lane.b32.xlu1 %v1523_v47, %s5440_s0 }
0x3860   :  { %v4250_v49 = vpop.permute.xlu1 %4249 }
0x3861   :  { %v4252_v50 = vadd.f32 %v4250_v49, %v4242_v48 }
0x3863   :  { %5403 = vtanh.f32 %v4252_v50 }
0x3864   :  { %v1065_v56 = vpop.permute.xlu1 %1064 }
0x3865   :  { %1067 = vst.msk [vmem:[%s6101_s2] sm:$0x3] %vm942_vm10, %v1065_v56 }
0x3868   :  { %v2895_v6 = vpop.permute.xlu1 %2894 }
0x3869   :  { %2897 = vst.msk [vmem:[%s6101_s2 + $0x2] sm:$0x3] %vm942_vm10, %v2895_v6 }
0x386a   :  { %3356 = vst.msk [vmem:[%s6101_s2 + $0x2] sm:$0x3] %vm1527_vm14, %v3354_v59 }
0x386c   :  { %v1525_v58 = vpop.permute.xlu1 %1524 }
0x386d   :  { %v5404_v51 = vpop.eup %5403  ;;  %1528 = vst.msk [vmem:[%s6101_s2] sm:$0x3] %vm1527_vm14, %v1525_v58 }
0x386e   :  { %1988 = vst.msk [vmem:[%s6101_s2] sm:$0x3] %vm1987_vm15, %v1985_v52  ;;  %4255 = vrot.lane.b32.xlu1 %v5404_v51, %s5440_s0 }
0x386f   :  { %2438 = vst.msk [vmem:[%s6101_s2] sm:$0x3] %vm2437_vm0, %v5812_v3 }
0x3872   :  { %3812 = vrot.lane.b32.xlu1 %v3811_v54, %s5444_s4 }
0x38e0   :  { %v4256_v55 = vpop.permute.xlu1 %4255 }
0x38e1   :  { %v4258_v13 = vmul.f32 %v5402_v2, %v4256_v55 }
0x38e4   :  { %v3813_v61 = vpop.permute.xlu1 %3812 }
0x38e5   :  { %3815 = vst.msk [vmem:[%s6101_s2 + $0x2] sm:$0x3] %vm1987_vm15, %v3813_v61 }
0x38e6   :  { %4259 = vst.msk [vmem:[%s6101_s2 + $0x2] sm:$0x3] %vm2437_vm0, %v4258_v13 }
0x38e7   :  { %4264 = vsyncpa [#allocation3], 1 }

</bundles_post_ra>
